<compile_context>
chip_gen: v7x
topology: tpu7x:2x2x1
jax: 0.10.0
libtpu: 0.0.40
codegen_flags: <defaults>
</compile_context>

<pallas_src>
import functools

import jax
import jax.numpy as jnp
from jax.experimental import pallas as pl
from jax.experimental.pallas import tpu as pltpu

LANE = 128          # TPU lane width: keep every feature dim a multiple of this
NEG_INF = -1e30     # drives softmax of padded output lanes to exactly 0


def _round_up(n, m):
    return ((n + m - 1) // m) * m


def _pg_kernel(x_ref,
               w1_ref, b1_ref,
               w2_ref, b2_ref,
               w3_ref, b3_ref,
               w4_ref, b4_ref,
               o_ref):
    """One (TB, 128) batch tile through the whole MLP + softmax.

    Weights are bf16; accumulation and all elementwise math (bias add, ReLU,
    softmax) are f32."""
    x = x_ref[...]

    h = jnp.dot(x.astype(jnp.bfloat16), w1_ref[...],
                preferred_element_type=jnp.float32) + b1_ref[...]
    h = jnp.maximum(h, 0.0)

    h = jnp.dot(h.astype(jnp.bfloat16), w2_ref[...],
                preferred_element_type=jnp.float32) + b2_ref[...]
    h = jnp.maximum(h, 0.0)

    h = jnp.dot(h.astype(jnp.bfloat16), w3_ref[...],
                preferred_element_type=jnp.float32) + b3_ref[...]
    h = jnp.maximum(h, 0.0)

    logits = jnp.dot(h.astype(jnp.bfloat16), w4_ref[...],
                     preferred_element_type=jnp.float32) + b4_ref[...]

    # Numerically-stable softmax over the feature axis.  Padded output lanes
    # carry a -1e30 bias -> exp underflows to 0 -> they contribute nothing.
    m = jnp.max(logits, axis=1, keepdims=True)
    e = jnp.exp(logits - m)
    denom = jnp.sum(e, axis=1, keepdims=True)
    o_ref[...] = (e * pl.reciprocal(denom, approx=True)).astype(o_ref.dtype)


@functools.partial(jax.jit, static_argnames=("out_dim", "tb"))
def pg_forward(x, kparams, out_dim, tb=256):
    """x: [B, input_dim] f32; kparams: lane-padded bf16/f32 params.

    Returns [B, out_dim] f32 softmax probabilities."""
    B, in_dim = x.shape
    kp = kparams["w1"].shape[0]      # padded input width  (multiple of 128)
    np_ = kparams["w4"].shape[1]     # padded output width (multiple of 128)
    bp = _round_up(max(B, 1), tb)    # padded batch

    # Zero-pad batch rows and input lanes (pad rows are computed then dropped;
    # softmax is row-independent so they cannot affect real rows).
    xp = jnp.zeros((bp, kp), jnp.float32).at[:B, :in_dim].set(x)

    grid = (bp // tb,)

    def resident(shape):
        # Same block every grid step -> loaded once, stays in VMEM.
        return pl.BlockSpec(shape, lambda i: (0, 0))

    out_padded = pl.pallas_call(
        _pg_kernel,
        out_shape=jax.ShapeDtypeStruct((bp, np_), jnp.float32),
        grid=grid,
        in_specs=[
            pl.BlockSpec((tb, kp), lambda i: (i, 0)),          # x: streamed
            resident(kparams["w1"].shape), resident(kparams["b1"].shape),
            resident(kparams["w2"].shape), resident(kparams["b2"].shape),
            resident(kparams["w3"].shape), resident(kparams["b3"].shape),
            resident(kparams["w4"].shape), resident(kparams["b4"].shape),
        ],
        out_specs=pl.BlockSpec((tb, np_), lambda i: (i, 0)),
        compiler_params=pltpu.CompilerParams(
            dimension_semantics=("parallel",),   # shard batch tiles across TCs
        ),
    )(
        xp,
        kparams["w1"], kparams["b1"],
        kparams["w2"], kparams["b2"],
        kparams["w3"], kparams["b3"],
        kparams["w4"], kparams["b4"],
    )

    return out_padded[:B, :out_dim]


def init_pg_params(key, input_dim, output_dim):
    """PyTorch-Linear-like init (uniform +/- 1/sqrt(fan_in)).
    Logical params: weights [in, out] f32, biases [1, out] f32."""
    dims = [(input_dim, 128), (128, 128), (128, 64), (64, output_dim)]
    params = {}
    for idx, (fan_in, fan_out) in enumerate(dims, start=1):
        key, kw, kb = jax.random.split(key, 3)
        bound = 1.0 / jnp.sqrt(float(fan_in))
        params[f"w{idx}"] = jax.random.uniform(
            kw, (fan_in, fan_out), jnp.float32, minval=-bound, maxval=bound)
        params[f"b{idx}"] = jax.random.uniform(
            kb, (1, fan_out), jnp.float32, minval=-bound, maxval=bound)
    return params


def prepare_kernel_params(params):
    """Pad every weight/bias to lane-dense (multiple-of-128) shapes, cast
    weights to bf16.  Weight padding is zero; the FINAL bias's padded lanes
    are -1e30 so the in-kernel softmax gives those lanes probability 0."""
    def pad2(a, rows, cols, fill=0.0):
        r, c = a.shape
        return jnp.pad(a, ((0, rows - r), (0, cols - c)), constant_values=fill)

    n_layers = 4
    out = {}
    for idx in range(1, n_layers + 1):
        w = params[f"w{idx}"]
        b = params[f"b{idx}"]
        rp = _round_up(w.shape[0], LANE)
        cp = _round_up(w.shape[1], LANE)
        bias_fill = NEG_INF if idx == n_layers else 0.0
        out[f"w{idx}"] = pad2(w, rp, cp).astype(jnp.bfloat16)
        out[f"b{idx}"] = pad2(b, 1, cp, fill=bias_fill).astype(jnp.float32)
    return out


def pg_forward_ref_f32(x, params):
    """Original-module semantics, full f32."""
    h = jnp.maximum(x @ params["w1"] + params["b1"], 0.0)
    h = jnp.maximum(h @ params["w2"] + params["b2"], 0.0)
    h = jnp.maximum(h @ params["w3"] + params["b3"], 0.0)
    logits = h @ params["w4"] + params["b4"]
    return jax.nn.softmax(logits, axis=1)


def pg_forward_ref_bf16(x, params):
    """Matches the kernel's numerics: bf16 matmul inputs, f32 accumulation."""
    def mm(a, w):
        return jnp.dot(a.astype(jnp.bfloat16).astype(jnp.float32),
                       w.astype(jnp.bfloat16).astype(jnp.float32),
                       precision=jax.lax.Precision.HIGHEST)
    h = jnp.maximum(mm(x, params["w1"]) + params["b1"], 0.0)
    h = jnp.maximum(mm(h, params["w2"]) + params["b2"], 0.0)
    h = jnp.maximum(mm(h, params["w3"]) + params["b3"], 0.0)
    logits = mm(h, params["w4"]) + params["b4"]
    return jax.nn.softmax(logits, axis=1)


if __name__ == "__main__":
    # LunarLander-v2: observation dim 8, action dim 4. Small batch of states.
    INPUT_DIM, OUTPUT_DIM, BATCH = 8, 4, 2

    key = jax.random.PRNGKey(0)
    key, kx = jax.random.split(key)
    x = jax.random.normal(kx, (BATCH, INPUT_DIM), dtype=jnp.float32)

    params = init_pg_params(jax.random.PRNGKey(0), INPUT_DIM, OUTPUT_DIM)
    kparams = prepare_kernel_params(params)

    probs = pg_forward(x, kparams, out_dim=OUTPUT_DIM)
    probs = jax.block_until_ready(probs)

    assert probs.shape == (BATCH, OUTPUT_DIM)

    ref_bf16 = pg_forward_ref_bf16(x, params)   # same numerics as the kernel
    ref_f32 = pg_forward_ref_f32(x, params)     # original module semantics

    assert jnp.allclose(probs, ref_bf16, atol=2e-3, rtol=2e-3)
    assert jnp.allclose(probs, ref_f32, atol=5e-2, rtol=5e-2)
    assert jnp.allclose(jnp.sum(probs, axis=1), 1.0, atol=2e-3)

    print("KERNEL_OK")
</pallas_src>

<mosaic_0001>
module attributes {stable_mosaic.version = 11 : i64} {
  func.func @_pg_kernel(%arg0: i32, %arg1: memref<256x128xf32, #tpu.memory_space<vmem>>, %arg2: memref<128x128xbf16, #tpu.memory_space<vmem>>, %arg3: memref<1x128xf32, #tpu.memory_space<vmem>>, %arg4: memref<128x128xbf16, #tpu.memory_space<vmem>>, %arg5: memref<1x128xf32, #tpu.memory_space<vmem>>, %arg6: memref<128x128xbf16, #tpu.memory_space<vmem>>, %arg7: memref<1x128xf32, #tpu.memory_space<vmem>>, %arg8: memref<128x128xbf16, #tpu.memory_space<vmem>>, %arg9: memref<1x128xf32, #tpu.memory_space<vmem>>, %arg10: memref<256x128xf32, #tpu.memory_space<vmem>>) attributes {dimension_semantics = [#tpu.dimension_semantics<parallel>], iteration_bounds = array<i64: 1>, scalar_prefetch = 0 : i64, scratch_operands = 0 : i64, tpu.core_type = #tpu.core_type<tc>, window_params = [{transform_indices = @transform_0, window_bounds = array<i64: 256, 128>}, {pipeline_mode = #tpu.pipeline_mode<synchronous>, transform_indices = @transform_1, window_bounds = array<i64: 128, 128>}, {pipeline_mode = #tpu.pipeline_mode<synchronous>, transform_indices = @transform_2, window_bounds = array<i64: 1, 128>}, {pipeline_mode = #tpu.pipeline_mode<synchronous>, transform_indices = @transform_3, window_bounds = array<i64: 128, 128>}, {pipeline_mode = #tpu.pipeline_mode<synchronous>, transform_indices = @transform_4, window_bounds = array<i64: 1, 128>}, {pipeline_mode = #tpu.pipeline_mode<synchronous>, transform_indices = @transform_5, window_bounds = array<i64: 128, 128>}, {pipeline_mode = #tpu.pipeline_mode<synchronous>, transform_indices = @transform_6, window_bounds = array<i64: 1, 128>}, {pipeline_mode = #tpu.pipeline_mode<synchronous>, transform_indices = @transform_7, window_bounds = array<i64: 128, 128>}, {pipeline_mode = #tpu.pipeline_mode<synchronous>, transform_indices = @transform_8, window_bounds = array<i64: 1, 128>}, {transform_indices = @transform_9, window_bounds = array<i64: 256, 128>}]} {
    %c0 = arith.constant 0 : index
    %c0_0 = arith.constant 0 : index
    %0 = vector.load %arg1[%c0, %c0_0] : memref<256x128xf32, #tpu.memory_space<vmem>>, vector<256x128xf32>
    %1 = arith.truncf %0 : vector<256x128xf32> to vector<256x128xbf16>
    %c0_1 = arith.constant 0 : index
    %c0_2 = arith.constant 0 : index
    %2 = vector.load %arg2[%c0_1, %c0_2] : memref<128x128xbf16, #tpu.memory_space<vmem>>, vector<128x128xbf16>
    %cst = arith.constant dense<0.000000e+00> : vector<256x128xf32>
    %3 = tpu.matmul %1, %2, %cst {dimension_numbers = #tpu.dot_dimension_numbers<[1], [0], [0], [1], [0, 0, 1, 1], [], []>} : vector<256x128xbf16>, vector<128x128xbf16>, vector<256x128xf32> -> vector<256x128xf32>
    %c0_3 = arith.constant 0 : index
    %c0_4 = arith.constant 0 : index
    %4 = vector.load %arg3[%c0_3, %c0_4] : memref<1x128xf32, #tpu.memory_space<vmem>>, vector<1x128xf32>
    %5 = vector.broadcast %4 : vector<1x128xf32> to vector<256x128xf32>
    %6 = arith.addf %3, %5 : vector<256x128xf32>
    %cst_5 = arith.constant 0.000000e+00 : f32
    %7 = vector.broadcast %cst_5 : f32 to vector<256x128xf32>
    %8 = arith.maximumf %6, %7 : vector<256x128xf32>
    %9 = arith.truncf %8 : vector<256x128xf32> to vector<256x128xbf16>
    %c0_6 = arith.constant 0 : index
    %c0_7 = arith.constant 0 : index
    %10 = vector.load %arg4[%c0_6, %c0_7] : memref<128x128xbf16, #tpu.memory_space<vmem>>, vector<128x128xbf16>
    %cst_8 = arith.constant dense<0.000000e+00> : vector<256x128xf32>
    %11 = tpu.matmul %9, %10, %cst_8 {dimension_numbers = #tpu.dot_dimension_numbers<[1], [0], [0], [1], [0, 0, 1, 1], [], []>} : vector<256x128xbf16>, vector<128x128xbf16>, vector<256x128xf32> -> vector<256x128xf32>
    %c0_9 = arith.constant 0 : index
    %c0_10 = arith.constant 0 : index
    %12 = vector.load %arg5[%c0_9, %c0_10] : memref<1x128xf32, #tpu.memory_space<vmem>>, vector<1x128xf32>
    %13 = vector.broadcast %12 : vector<1x128xf32> to vector<256x128xf32>
    %14 = arith.addf %11, %13 : vector<256x128xf32>
    %cst_11 = arith.constant 0.000000e+00 : f32
    %15 = vector.broadcast %cst_11 : f32 to vector<256x128xf32>
    %16 = arith.maximumf %14, %15 : vector<256x128xf32>
    %17 = arith.truncf %16 : vector<256x128xf32> to vector<256x128xbf16>
    %c0_12 = arith.constant 0 : index
    %c0_13 = arith.constant 0 : index
    %18 = vector.load %arg6[%c0_12, %c0_13] : memref<128x128xbf16, #tpu.memory_space<vmem>>, vector<128x128xbf16>
    %cst_14 = arith.constant dense<0.000000e+00> : vector<256x128xf32>
    %19 = tpu.matmul %17, %18, %cst_14 {dimension_numbers = #tpu.dot_dimension_numbers<[1], [0], [0], [1], [0, 0, 1, 1], [], []>} : vector<256x128xbf16>, vector<128x128xbf16>, vector<256x128xf32> -> vector<256x128xf32>
    %c0_15 = arith.constant 0 : index
    %c0_16 = arith.constant 0 : index
    %20 = vector.load %arg7[%c0_15, %c0_16] : memref<1x128xf32, #tpu.memory_space<vmem>>, vector<1x128xf32>
    %21 = vector.broadcast %20 : vector<1x128xf32> to vector<256x128xf32>
    %22 = arith.addf %19, %21 : vector<256x128xf32>
    %cst_17 = arith.constant 0.000000e+00 : f32
    %23 = vector.broadcast %cst_17 : f32 to vector<256x128xf32>
    %24 = arith.maximumf %22, %23 : vector<256x128xf32>
    %25 = arith.truncf %24 : vector<256x128xf32> to vector<256x128xbf16>
    %c0_18 = arith.constant 0 : index
    %c0_19 = arith.constant 0 : index
    %26 = vector.load %arg8[%c0_18, %c0_19] : memref<128x128xbf16, #tpu.memory_space<vmem>>, vector<128x128xbf16>
    %cst_20 = arith.constant dense<0.000000e+00> : vector<256x128xf32>
    %27 = tpu.matmul %25, %26, %cst_20 {dimension_numbers = #tpu.dot_dimension_numbers<[1], [0], [0], [1], [0, 0, 1, 1], [], []>} : vector<256x128xbf16>, vector<128x128xbf16>, vector<256x128xf32> -> vector<256x128xf32>
    %c0_21 = arith.constant 0 : index
    %c0_22 = arith.constant 0 : index
    %28 = vector.load %arg9[%c0_21, %c0_22] : memref<1x128xf32, #tpu.memory_space<vmem>>, vector<1x128xf32>
    %29 = vector.broadcast %28 : vector<1x128xf32> to vector<256x128xf32>
    %30 = arith.addf %27, %29 : vector<256x128xf32>
    %cst_23 = arith.constant dense<0xFF800000> : vector<256xf32>
    %31 = vector.multi_reduction <maximumf>, %30, %cst_23 [1] : vector<256x128xf32> to vector<256xf32>
    %32 = vector.shape_cast %31 : vector<256xf32> to vector<256x1xf32>
    %33 = vector.broadcast %32 : vector<256x1xf32> to vector<256x128xf32>
    %34 = arith.subf %30, %33 : vector<256x128xf32>
    %35 = math.exp %34 : vector<256x128xf32>
    %cst_24 = arith.constant dense<0.000000e+00> : vector<256xf32>
    %36 = vector.multi_reduction <add>, %35, %cst_24 [1] : vector<256x128xf32> to vector<256xf32>
    %37 = vector.shape_cast %36 : vector<256xf32> to vector<256x1xf32>
    %38 = tpu.reciprocal %37 {approx = true} : vector<256x1xf32> -> vector<256x1xf32>
    %39 = vector.broadcast %38 : vector<256x1xf32> to vector<256x128xf32>
    %40 = arith.mulf %35, %39 : vector<256x128xf32>
    %c0_25 = arith.constant 0 : index
    %c0_26 = arith.constant 0 : index
    %41 = vector.load %arg10[%c0_25, %c0_26] : memref<256x128xf32, #tpu.memory_space<vmem>>, vector<256x128xf32>
    tpu.vector_store %arg10[%c0_25, %c0_26], %40 {strides = array<i32>} : memref<256x128xf32, #tpu.memory_space<vmem>>, vector<256x128xf32>,
    return
  }
  func.func @transform_0(%arg0: i32) -> (i32, i32) {
    %c0_i32 = arith.constant 0 : i32
    %c0_i32_0 = arith.constant 0 : i32
    return %arg0, %c0_i32 : i32, i32
  }
  func.func @transform_1(%arg0: i32) -> (i32, i32) {
    %c0_i32 = arith.constant 0 : i32
    %c0_i32_0 = arith.constant 0 : i32
    %c0_i32_1 = arith.constant 0 : i32
    return %c0_i32, %c0_i32_0 : i32, i32
  }
  func.func @transform_2(%arg0: i32) -> (i32, i32) {
    %c0_i32 = arith.constant 0 : i32
    %c0_i32_0 = arith.constant 0 : i32
    %c0_i32_1 = arith.constant 0 : i32
    return %c0_i32, %c0_i32_0 : i32, i32
  }
  func.func @transform_3(%arg0: i32) -> (i32, i32) {
    %c0_i32 = arith.constant 0 : i32
    %c0_i32_0 = arith.constant 0 : i32
    %c0_i32_1 = arith.constant 0 : i32
    return %c0_i32, %c0_i32_0 : i32, i32
  }
  func.func @transform_4(%arg0: i32) -> (i32, i32) {
    %c0_i32 = arith.constant 0 : i32
    %c0_i32_0 = arith.constant 0 : i32
    %c0_i32_1 = arith.constant 0 : i32
    return %c0_i32, %c0_i32_0 : i32, i32
  }
  func.func @transform_5(%arg0: i32) -> (i32, i32) {
    %c0_i32 = arith.constant 0 : i32
    %c0_i32_0 = arith.constant 0 : i32
    %c0_i32_1 = arith.constant 0 : i32
    return %c0_i32, %c0_i32_0 : i32, i32
  }
  func.func @transform_6(%arg0: i32) -> (i32, i32) {
    %c0_i32 = arith.constant 0 : i32
    %c0_i32_0 = arith.constant 0 : i32
    %c0_i32_1 = arith.constant 0 : i32
    return %c0_i32, %c0_i32_0 : i32, i32
  }
  func.func @transform_7(%arg0: i32) -> (i32, i32) {
    %c0_i32 = arith.constant 0 : i32
    %c0_i32_0 = arith.constant 0 : i32
    %c0_i32_1 = arith.constant 0 : i32
    return %c0_i32, %c0_i32_0 : i32, i32
  }
  func.func @transform_8(%arg0: i32) -> (i32, i32) {
    %c0_i32 = arith.constant 0 : i32
    %c0_i32_0 = arith.constant 0 : i32
    %c0_i32_1 = arith.constant 0 : i32
    return %c0_i32, %c0_i32_0 : i32, i32
  }
  func.func @transform_9(%arg0: i32) -> (i32, i32) {
    %c0_i32 = arith.constant 0 : i32
    %c0_i32_0 = arith.constant 0 : i32
    return %arg0, %c0_i32 : i32, i32
  }
}

</mosaic_0001>

<bundles_post_ra>
// kernel: pg_forward.1
= control target key start
LH: loop header
LB: loop body
LE: loop exit
PB: predicated region body
PF: predicated region fallthrough
CT: control target
= control target key end

     0   :  { %s2703_s1 = inlined_call_operand.vmem [shape: bf16[128,128], index: 1, kind: input, shape index: {}]   ;;  %s2704_s0 = inlined_call_operand.vmem [shape: f32[256,128], index: 0, kind: input, shape index: {}]   ;;  %s2705_s3 = inlined_call_operand.vmem [shape: bf16[128,128], index: 3, kind: input, shape index: {}]   ;;  %s2706_s5 = inlined_call_operand.vmem [shape: bf16[128,128], index: 5, kind: input, shape index: {}]   ;;  %s2707_s2 = inlined_call_operand.vmem [shape: f32[1,128], index: 2, kind: input, shape index: {}]   ;;  %s2708_s7 = inlined_call_operand.vmem [shape: bf16[128,128], index: 7, kind: input, shape index: {}]   ;;  %s2709_s4 = inlined_call_operand.vmem [shape: f32[1,128], index: 4, kind: input, shape index: {}]   ;;  %s2710_s6 = inlined_call_operand.vmem [shape: f32[1,128], index: 6, kind: input, shape index: {}]   ;;  %s2711_s8 = inlined_call_operand.vmem [shape: f32[1,128], index: 8, kind: input, shape index: {}]   ;;  %s2712_s9 = inlined_call_operand.vmem [shape: f32[256,128], index: 9, kind: output, shape index: {}]  }
   0x1   :  { %v1801_v0 = vld [vmem:[%s2703_s1] sm:$0xff]   ;;  %v1802_v1 = vld [vmem:[%s2703_s1 + $0x8] sm:$0xff]   ;;  %v1803_v2 = vld [vmem:[%s2703_s1 + $0x10] sm:$0xff]  }
   0x2   :  { %1609 = vmatprep.subr.bf16.mxu0 %v1801_v0  ;;  %v1804_v3 = vld [vmem:[%s2703_s1 + $0x18] sm:$0xff]   ;;  %v33_v4 = vld [vmem:[%s2704_s0] sm:$0xff]  ;;  %v34_v5 = vld [vmem:[%s2704_s0 + $0x8] sm:$0xff] }
   0x3   :  { %1610 = vmatpush3.bf16.msra.mxu0 %v1801_v0  ;;  %v65_v6 = vpack.c.bf16 %v34_v5, %v33_v4  ;;  %v1805_v7 = vld [vmem:[%s2703_s1 + $0x20] sm:$0xff]   ;;  %v1806_v8 = vld [vmem:[%s2703_s1 + $0x28] sm:$0xff]   ;;  %v1807_v9 = vld [vmem:[%s2703_s1 + $0x30] sm:$0xff]  }
   0x4   :  { %1611 = vmatprep.subr.bf16.mxu0 %v1802_v1  ;;  %v1809_v10 = vld [vmem:[%s2705_s3] sm:$0xff]   ;;  %v1810_v11 = vld [vmem:[%s2705_s3 + $0x8] sm:$0xff]   ;;  %v1811_v12 = vld [vmem:[%s2705_s3 + $0x10] sm:$0xff]  }
   0x5   :  { %1625 = vmatprep.mubr.bf16.mxu0 %v65_v6  ;;  %1657 = vmatprep.subr.bf16.mxu1 %v1809_v10  ;;  %v1808_v13 = vld [vmem:[%s2703_s1 + $0x38] sm:$0xff]   ;;  %v35_v14 = vld [vmem:[%s2704_s0 + $0x10] sm:$0xff]  ;;  %v37_v17 = vld [vmem:[%s2704_s0 + $0x20] sm:$0xff] }
   0x6   :  { %1658 = vmatpush3.bf16.msra.mxu1 %v1809_v10  ;;  %v36_v15 = vld [vmem:[%s2704_s0 + $0x18] sm:$0xff]  ;;  %v38_v18 = vld [vmem:[%s2704_s0 + $0x28] sm:$0xff]  ;;  %v1813_v21 = vld [vmem:[%s2705_s3 + $0x20] sm:$0xff]  }
   0x7   :  { %1612 = vmatpush3.bf16.msra.mxu0 %v1802_v1  ;;  %1659 = vmatprep.subr.bf16.mxu1 %v1810_v11  ;;  %v1812_v16 = vld [vmem:[%s2705_s3 + $0x18] sm:$0xff]   ;;  %v66_v19 = vpack.c.bf16 %v36_v15, %v35_v14  ;;  %v67_v20 = vpack.c.bf16 %v38_v18, %v37_v17  ;;  %v39_v22 = vld [vmem:[%s2704_s0 + $0x30] sm:$0xff]  ;;  %v1814_v24 = vld [vmem:[%s2705_s3 + $0x28] sm:$0xff]  }
   0x8   :  { %1613 = vmatprep.subr.bf16.mxu0 %v1803_v2  ;;  %v40_v23 = vld [vmem:[%s2704_s0 + $0x38] sm:$0xff]  ;;  %v41_v25 = vld [vmem:[%s2704_s0 + $0x40] sm:$0xff]  ;;  %v42_v26 = vld [vmem:[%s2704_s0 + $0x48] sm:$0xff] }
   0x9   :  { %v68_v27 = vpack.c.bf16 %v40_v23, %v39_v22  ;;  %v69_v28 = vpack.c.bf16 %v42_v26, %v41_v25  ;;  %v43_v29 = vld [vmem:[%s2704_s0 + $0x50] sm:$0xff]  ;;  %v44_v30 = vld [vmem:[%s2704_s0 + $0x58] sm:$0xff]  ;;  %v45_v31 = vld [vmem:[%s2704_s0 + $0x60] sm:$0xff] }
   0xa   :  { %1660 = vmatpush3.bf16.msra.mxu1 %v1810_v11  ;;  %v46_v32 = vld [vmem:[%s2704_s0 + $0x68] sm:$0xff]  ;;  %v70_v33 = vpack.c.bf16 %v44_v30, %v43_v29  ;;  %v47_v35 = vld [vmem:[%s2704_s0 + $0x70] sm:$0xff]  ;;  %v48_v36 = vld [vmem:[%s2704_s0 + $0x78] sm:$0xff] }
   0xb   :  { %1614 = vmatpush3.bf16.msra.mxu0 %v1803_v2  ;;  %1661 = vmatprep.subr.bf16.mxu1 %v1811_v12  ;;  %v71_v34 = vpack.c.bf16 %v46_v32, %v45_v31  ;;  %v49_v37 = vld [vmem:[%s2704_s0 + $0x80] sm:$0xff]  ;;  %v50_v38 = vld [vmem:[%s2704_s0 + $0x88] sm:$0xff]  ;;  %v72_v39 = vpack.c.bf16 %v48_v36, %v47_v35  ;;  %v51_v41 = vld [vmem:[%s2704_s0 + $0x90] sm:$0xff] }
   0xc   :  { %1615 = vmatprep.subr.bf16.mxu0 %v1804_v3  ;;  %v73_v40 = vpack.c.bf16 %v50_v38, %v49_v37  ;;  %v52_v42 = vld [vmem:[%s2704_s0 + $0x98] sm:$0xff]  ;;  %v53_v43 = vld [vmem:[%s2704_s0 + $0xa0] sm:$0xff]  ;;  %v54_v44 = vld [vmem:[%s2704_s0 + $0xa8] sm:$0xff] }
   0xd   :  { %v74_v45 = vpack.c.bf16 %v52_v42, %v51_v41  ;;  %v75_v46 = vpack.c.bf16 %v54_v44, %v53_v43  ;;  %v55_v47 = vld [vmem:[%s2704_s0 + $0xb0] sm:$0xff]  ;;  %v56_v48 = vld [vmem:[%s2704_s0 + $0xb8] sm:$0xff]  ;;  %v57_v49 = vld [vmem:[%s2704_s0 + $0xc0] sm:$0xff] }
   0xe   :  { %1662 = vmatpush3.bf16.msra.mxu1 %v1811_v12  ;;  %v58_v50 = vld [vmem:[%s2704_s0 + $0xc8] sm:$0xff]  ;;  %v76_v51 = vpack.c.bf16 %v56_v48, %v55_v47  ;;  %v59_v53 = vld [vmem:[%s2704_s0 + $0xd0] sm:$0xff]  ;;  %v60_v54 = vld [vmem:[%s2704_s0 + $0xd8] sm:$0xff] }
   0xf   :  { %1616 = vmatpush3.bf16.msra.mxu0 %v1804_v3  ;;  %1663 = vmatprep.subr.bf16.mxu1 %v1812_v16  ;;  %v77_v52 = vpack.c.bf16 %v58_v50, %v57_v49  ;;  %v61_v55 = vld [vmem:[%s2704_s0 + $0xe0] sm:$0xff]  ;;  %v62_v56 = vld [vmem:[%s2704_s0 + $0xe8] sm:$0xff]  ;;  %v78_v57 = vpack.c.bf16 %v60_v54, %v59_v53  ;;  %v63_v59 = vld [vmem:[%s2704_s0 + $0xf0] sm:$0xff] }
  0x10   :  { %1617 = vmatprep.subr.bf16.mxu0 %v1805_v7  ;;  %v79_v58 = vpack.c.bf16 %v62_v56, %v61_v55  ;;  %v64_v60 = vld [vmem:[%s2704_s0 + $0xf8] sm:$0xff]  ;;  %v1815_v62 = vld [vmem:[%s2705_s3 + $0x30] sm:$0xff]   ;;  %v1817_v0 = vld [vmem:[%s2706_s5] sm:$0xff]  }
  0x11   :  { %v80_v61 = vpack.c.bf16 %v64_v60, %v63_v59  ;;  %v1816_v63 = vld [vmem:[%s2705_s3 + $0x38] sm:$0xff]   ;;  %v1818_v1 = vld [vmem:[%s2706_s5 + $0x8] sm:$0xff]   ;;  %v1819_v2 = vld [vmem:[%s2706_s5 + $0x10] sm:$0xff]  }
  0x12   :  { %1664 = vmatpush3.bf16.msra.mxu1 %v1812_v16  ;;  %v1820_v3 = vld [vmem:[%s2706_s5 + $0x18] sm:$0xff]   ;;  %v1821_v4 = vld [vmem:[%s2706_s5 + $0x20] sm:$0xff]   ;;  %v1822_v5 = vld [vmem:[%s2706_s5 + $0x28] sm:$0xff]  }
  0x13   :  { %1618 = vmatpush3.bf16.msra.mxu0 %v1805_v7  ;;  %1665 = vmatprep.subr.bf16.mxu1 %v1813_v21  ;;  %v1823_v6 = vld [vmem:[%s2706_s5 + $0x30] sm:$0xff]   ;;  %v2179_v7 = vld [vmem:[%s2707_s2] ss:$0 sm:$0xff] }
  0x14   :  { %1619 = vmatprep.subr.bf16.mxu0 %v1806_v8 }
  0x16   :  { %1666 = vmatpush3.bf16.msra.mxu1 %v1813_v21 }
  0x17   :  { %1620 = vmatpush3.bf16.msra.mxu0 %v1806_v8  ;;  %1667 = vmatprep.subr.bf16.mxu1 %v1814_v24 }
  0x18   :  { %1621 = vmatprep.subr.bf16.mxu0 %v1807_v9 }
  0x1a   :  { %1668 = vmatpush3.bf16.msra.mxu1 %v1814_v24 }
  0x1b   :  { %1622 = vmatpush3.bf16.msra.mxu0 %v1807_v9  ;;  %1669 = vmatprep.subr.bf16.mxu1 %v1815_v62 }
  0x1c   :  { %1623 = vmatprep.subr.bf16.mxu0 %v1808_v13 }
  0x1e   :  { %1670 = vmatpush3.bf16.msra.mxu1 %v1815_v62 }
  0x1f   :  { %1624 = vmatpush3.bf16.msra.mxu0 %v1808_v13  ;;  %1671 = vmatprep.subr.bf16.mxu1 %v1816_v63 }
  0x20   :  { %1705 = vmatprep.subr.bf16.mxu0 %v1817_v0 }
  0x22   :  { %1626 = vmatmul.mubr.bf16.vlgmr.msra.gmra.mrb[0].mxu0 %v66_v19  ;;  %1672 = vmatpush3.bf16.msra.mxu1 %v1816_v63 }
  0x23   :  { %1629 = vmatprep.mubr.bf16.mxu0 %v67_v20  ;;  %1706 = vmatpush3.bf16.msra.mxu0 %v1817_v0 }
  0x24   :  { %1707 = vmatprep.subr.bf16.mxu0 %v1818_v1 }
  0x27   :  { %1708 = vmatpush3.bf16.msra.mxu0 %v1818_v1 }
  0x28   :  { %1709 = vmatprep.subr.bf16.mxu0 %v1819_v2 }
  0x2a   :  { %1630 = vmatmul.mubr.bf16.gmra.mrb[4].mxu0 %v68_v27 }
  0x2b   :  { %1633 = vmatprep.mubr.bf16.mxu0 %v69_v28  ;;  %1710 = vmatpush3.bf16.msra.mxu0 %v1819_v2 }
  0x2c   :  { %1711 = vmatprep.subr.bf16.mxu0 %v1820_v3 }
  0x2f   :  { %1712 = vmatpush3.bf16.msra.mxu0 %v1820_v3 }
  0x30   :  { %1713 = vmatprep.subr.bf16.mxu0 %v1821_v4 }
  0x32   :  { %1634 = vmatmul.mubr.bf16.gmra.mrb[8].mxu0 %v70_v33 }
  0x33   :  { %1637 = vmatprep.mubr.bf16.mxu0 %v71_v34  ;;  %1714 = vmatpush3.bf16.msra.mxu0 %v1821_v4 }
  0x34   :  { %1715 = vmatprep.subr.bf16.mxu0 %v1822_v5 }
  0x37   :  { %1716 = vmatpush3.bf16.msra.mxu0 %v1822_v5 }
  0x38   :  { %1717 = vmatprep.subr.bf16.mxu0 %v1823_v6 }
  0x3a   :  { %1638 = vmatmul.mubr.bf16.gmra.mrb[12].mxu0 %v72_v39 }
  0x3b   :  { %1641 = vmatprep.mubr.bf16.mxu0 %v73_v40  ;;  %1718 = vmatpush3.bf16.msra.mxu0 %v1823_v6 }
  0x42   :  { %1642 = vmatmul.mubr.bf16.gmra.mrb[16].mxu0 %v74_v45 }
  0x43   :  { %1645 = vmatprep.mubr.bf16.mxu0 %v75_v46 }
  0x4a   :  { %1646 = vmatmul.mubr.bf16.gmra.mrb[20].mxu0 %v76_v51 }
  0x4b   :  { %1649 = vmatprep.mubr.bf16.mxu0 %v77_v52 }
  0x52   :  { %1650 = vmatmul.mubr.bf16.gmra.mrb[24].mxu0 %v78_v57 }
  0x53   :  { %1653 = vmatprep.mubr.bf16.mxu0 %v79_v58 }
  0x5a   :  { %1654 = vmatmul.mubr.bf16.gmra.mrb[28].mxu0 %v80_v61 }
  0xf5   :  { %v1627_v8 = vpop.f32.mrb[0].mxu0 }
  0xf6   :  { %v195_v9 = vadd.f32 %v1627_v8, %v2179_v7  ;;  %v186_v10 = vpop.f32.mrb[1].mxu0 }
  0xf7   :  { %v187_v11 = vadd.f32 %v2179_v7, %v186_v10  ;;  %v1628_v12 = vpop.f32.mrb[2].mxu0 }
  0xf8   :  { %v198_v13 = vadd.f32 %v1628_v12, %v2179_v7  ;;  %v189_v14 = vpop.f32.mrb[3].mxu0  ;;  %v315_v16 = vmax.f32 %v195_v9, 0.0 }
  0xf9   :  { %v190_v15 = vadd.f32 %v2179_v7, %v189_v14  ;;  %v313_v18 = vmax.f32 %v187_v11, 0.0 }
  0xfa   :  { %v316_v17 = vmax.f32 %v198_v13, 0.0 }
  0xfb   :  { %v314_v19 = vmax.f32 %v190_v15, 0.0 }
  0xfc   :  { %v346_v20 = vpack.c.bf16 %v316_v17, %v315_v16 }
  0xfd   :  { %v1631_v21 = vpop.f32.mrb[4].mxu0  ;;  %v345_v22 = vpack.c.bf16 %v314_v19, %v313_v18 }
  0xfe   :  { %v211_v23 = vadd.f32 %v1631_v21, %v2179_v7  ;;  %v202_v24 = vpop.f32.mrb[5].mxu0 }
  0xff   :  { %v203_v25 = vadd.f32 %v2179_v7, %v202_v24  ;;  %v1632_v26 = vpop.f32.mrb[6].mxu0  ;;  %1673 = vmatprep.mubr.bf16.mxu1 %v345_v22 }
 0x100   :  { %v319_v27 = vmax.f32 %v211_v23, 0.0  ;;  %v214_v28 = vadd.f32 %v1632_v26, %v2179_v7  ;;  %v205_v29 = vpop.f32.mrb[7].mxu0  ;;  %1674 = vmatmul.mubr.bf16.vlgmr.msra.gmra.mrb[0].mxu1 %v346_v20 }
 0x101   :  { %v206_v30 = vadd.f32 %v2179_v7, %v205_v29  ;;  %v317_v32 = vmax.f32 %v203_v25, 0.0 }
 0x102   :  { %v320_v31 = vmax.f32 %v214_v28, 0.0 }
 0x103   :  { %v318_v33 = vmax.f32 %v206_v30, 0.0 }
 0x104   :  { %v348_v34 = vpack.c.bf16 %v320_v31, %v319_v27 }
 0x105   :  { %v347_v35 = vpack.c.bf16 %v318_v33, %v317_v32  ;;  %v1635_v36 = vpop.f32.mrb[8].mxu0 }
 0x106   :  { %v227_v37 = vadd.f32 %v1635_v36, %v2179_v7  ;;  %v218_v38 = vpop.f32.mrb[9].mxu0 }
 0x107   :  { %v219_v39 = vadd.f32 %v2179_v7, %v218_v38  ;;  %v1636_v40 = vpop.f32.mrb[10].mxu0  ;;  %1677 = vmatprep.mubr.bf16.mxu1 %v347_v35 }
 0x108   :  { %v323_v41 = vmax.f32 %v227_v37, 0.0  ;;  %v230_v42 = vadd.f32 %v1636_v40, %v2179_v7  ;;  %v221_v43 = vpop.f32.mrb[11].mxu0  ;;  %1678 = vmatmul.mubr.bf16.gmra.mrb[4].mxu1 %v348_v34 }
 0x109   :  { %v222_v44 = vadd.f32 %v2179_v7, %v221_v43  ;;  %v321_v46 = vmax.f32 %v219_v39, 0.0 }
 0x10a   :  { %v324_v45 = vmax.f32 %v230_v42, 0.0 }
 0x10b   :  { %v322_v47 = vmax.f32 %v222_v44, 0.0 }
 0x10c   :  { %v350_v48 = vpack.c.bf16 %v324_v45, %v323_v41 }
 0x10d   :  { %v349_v49 = vpack.c.bf16 %v322_v47, %v321_v46  ;;  %v1639_v50 = vpop.f32.mrb[12].mxu0 }
 0x10e   :  { %v243_v51 = vadd.f32 %v1639_v50, %v2179_v7  ;;  %v234_v52 = vpop.f32.mrb[13].mxu0 }
 0x10f   :  { %v235_v53 = vadd.f32 %v2179_v7, %v234_v52  ;;  %v1640_v54 = vpop.f32.mrb[14].mxu0  ;;  %1681 = vmatprep.mubr.bf16.mxu1 %v349_v49 }
 0x110   :  { %v327_v55 = vmax.f32 %v243_v51, 0.0  ;;  %v246_v56 = vadd.f32 %v1640_v54, %v2179_v7  ;;  %v237_v57 = vpop.f32.mrb[15].mxu0  ;;  %1682 = vmatmul.mubr.bf16.gmra.mrb[8].mxu1 %v350_v48 }
 0x111   :  { %v238_v58 = vadd.f32 %v2179_v7, %v237_v57  ;;  %v325_v60 = vmax.f32 %v235_v53, 0.0  ;;  %v1824_v57 = vld [vmem:[%s2706_s5 + $0x38] sm:$0xff]  }
 0x112   :  { %v328_v59 = vmax.f32 %v246_v56, 0.0  ;;  %1719 = vmatprep.subr.bf16.mxu0 %v1824_v57 }
 0x113   :  { %v326_v61 = vmax.f32 %v238_v58, 0.0  ;;  %1720 = vmatpush3.bf16.msra.mxu0 %v1824_v57  ;;  %v1825_v58 = vld [vmem:[%s2708_s7] sm:$0xff]  }
 0x114   :  { %v352_v62 = vpack.c.bf16 %v328_v59, %v327_v55  ;;  %1753 = vmatprep.subr.bf16.mxu1 %v1825_v58  ;;  %v1827_v59 = vld [vmem:[%s2708_s7 + $0x10] sm:$0xff]  }
 0x115   :  { %v351_v63 = vpack.c.bf16 %v326_v61, %v325_v60  ;;  %v1643_v0 = vpop.f32.mrb[16].mxu0  ;;  %1754 = vmatpush3.bf16.msra.mxu1 %v1825_v58  ;;  %v1828_v60 = vld [vmem:[%s2708_s7 + $0x18] sm:$0xff]   ;;  %v1829_v61 = vld [vmem:[%s2708_s7 + $0x20] sm:$0xff]  }
 0x116   :  { %v259_v1 = vadd.f32 %v1643_v0, %v2179_v7  ;;  %v250_v2 = vpop.f32.mrb[17].mxu0  ;;  %v2240_v0 = vld [vmem:[%s2709_s4] ss:$0 sm:$0xff] }
 0x117   :  { %v251_v3 = vadd.f32 %v2179_v7, %v250_v2  ;;  %v1644_v4 = vpop.f32.mrb[18].mxu0  ;;  %1685 = vmatprep.mubr.bf16.mxu1 %v351_v63  ;;  %v1831_v63 = vld [vmem:[%s2708_s7 + $0x30] sm:$0xff]  }
 0x118   :  { %v331_v5 = vmax.f32 %v259_v1, 0.0  ;;  %v262_v6 = vadd.f32 %v1644_v4, %v2179_v7  ;;  %v253_v8 = vpop.f32.mrb[19].mxu0  ;;  %1686 = vmatmul.mubr.bf16.gmra.mrb[12].mxu1 %v352_v62  ;;  %v1830_v62 = vld [vmem:[%s2708_s7 + $0x28] sm:$0xff]  }
 0x119   :  { %v254_v9 = vadd.f32 %v2179_v7, %v253_v8  ;;  %v329_v11 = vmax.f32 %v251_v3, 0.0 }
 0x11a   :  { %v332_v10 = vmax.f32 %v262_v6, 0.0 }
 0x11b   :  { %v330_v12 = vmax.f32 %v254_v9, 0.0 }
 0x11c   :  { %v354_v13 = vpack.c.bf16 %v332_v10, %v331_v5 }
 0x11d   :  { %v353_v14 = vpack.c.bf16 %v330_v12, %v329_v11  ;;  %v1647_v15 = vpop.f32.mrb[20].mxu0 }
 0x11e   :  { %v275_v16 = vadd.f32 %v1647_v15, %v2179_v7  ;;  %v266_v17 = vpop.f32.mrb[21].mxu0 }
 0x11f   :  { %v267_v18 = vadd.f32 %v2179_v7, %v266_v17  ;;  %v1648_v19 = vpop.f32.mrb[22].mxu0  ;;  %1689 = vmatprep.mubr.bf16.mxu1 %v353_v14 }
 0x120   :  { %v335_v20 = vmax.f32 %v275_v16, 0.0  ;;  %v278_v21 = vadd.f32 %v1648_v19, %v2179_v7  ;;  %v269_v22 = vpop.f32.mrb[23].mxu0  ;;  %1690 = vmatmul.mubr.bf16.gmra.mrb[16].mxu1 %v354_v13 }
 0x121   :  { %v270_v23 = vadd.f32 %v2179_v7, %v269_v22  ;;  %v333_v25 = vmax.f32 %v267_v18, 0.0 }
 0x122   :  { %v336_v24 = vmax.f32 %v278_v21, 0.0 }
 0x123   :  { %v334_v26 = vmax.f32 %v270_v23, 0.0 }
 0x124   :  { %v356_v27 = vpack.c.bf16 %v336_v24, %v335_v20 }
 0x125   :  { %v355_v28 = vpack.c.bf16 %v334_v26, %v333_v25  ;;  %v1651_v29 = vpop.f32.mrb[24].mxu0 }
 0x126   :  { %v291_v30 = vadd.f32 %v1651_v29, %v2179_v7  ;;  %v282_v31 = vpop.f32.mrb[25].mxu0 }
 0x127   :  { %v283_v32 = vadd.f32 %v2179_v7, %v282_v31  ;;  %v1652_v33 = vpop.f32.mrb[26].mxu0  ;;  %1693 = vmatprep.mubr.bf16.mxu1 %v355_v28 }
 0x128   :  { %v339_v34 = vmax.f32 %v291_v30, 0.0  ;;  %v294_v35 = vadd.f32 %v1652_v33, %v2179_v7  ;;  %v285_v36 = vpop.f32.mrb[27].mxu0  ;;  %1694 = vmatmul.mubr.bf16.gmra.mrb[20].mxu1 %v356_v27 }
 0x129   :  { %v286_v37 = vadd.f32 %v2179_v7, %v285_v36  ;;  %v337_v39 = vmax.f32 %v283_v32, 0.0 }
 0x12a   :  { %v340_v38 = vmax.f32 %v294_v35, 0.0 }
 0x12b   :  { %v338_v40 = vmax.f32 %v286_v37, 0.0 }
 0x12c   :  { %v358_v41 = vpack.c.bf16 %v340_v38, %v339_v34 }
 0x12d   :  { %v357_v42 = vpack.c.bf16 %v338_v40, %v337_v39  ;;  %v1655_v43 = vpop.f32.mrb[28].mxu0 }
 0x12e   :  { %v307_v44 = vadd.f32 %v1655_v43, %v2179_v7  ;;  %v298_v45 = vpop.f32.mrb[29].mxu0 }
 0x12f   :  { %v299_v46 = vadd.f32 %v2179_v7, %v298_v45  ;;  %v1656_v47 = vpop.f32.mrb[30].mxu0  ;;  %1697 = vmatprep.mubr.bf16.mxu1 %v357_v42 }
 0x130   :  { %v343_v48 = vmax.f32 %v307_v44, 0.0  ;;  %v310_v49 = vadd.f32 %v1656_v47, %v2179_v7  ;;  %v301_v50 = vpop.f32.mrb[31].mxu0  ;;  %1698 = vmatmul.mubr.bf16.gmra.mrb[24].mxu1 %v358_v41 }
 0x131   :  { %v302_v51 = vadd.f32 %v2179_v7, %v301_v50  ;;  %v341_v53 = vmax.f32 %v299_v46, 0.0  ;;  %v1826_v7 = vld [vmem:[%s2708_s7 + $0x8] sm:$0xff]  }
 0x132   :  { %v344_v52 = vmax.f32 %v310_v49, 0.0  ;;  %1755 = vmatprep.subr.bf16.mxu1 %v1826_v7 }
 0x133   :  { %v342_v54 = vmax.f32 %v302_v51, 0.0  ;;  %1756 = vmatpush3.bf16.msra.mxu1 %v1826_v7 }
 0x134   :  { %v360_v55 = vpack.c.bf16 %v344_v52, %v343_v48  ;;  %1757 = vmatprep.subr.bf16.mxu1 %v1827_v59 }
 0x135   :  { %v359_v56 = vpack.c.bf16 %v342_v54, %v341_v53 }
 0x137   :  { %1701 = vmatprep.mubr.bf16.mxu1 %v359_v56  ;;  %1758 = vmatpush3.bf16.msra.mxu1 %v1827_v59 }
 0x138   :  { %1702 = vmatmul.mubr.bf16.gmra.mrb[28].mxu1 %v360_v55  ;;  %1759 = vmatprep.subr.bf16.mxu1 %v1828_v60 }
 0x13b   :  { %1760 = vmatpush3.bf16.msra.mxu1 %v1828_v60 }
 0x13c   :  { %1761 = vmatprep.subr.bf16.mxu1 %v1829_v61 }
 0x13f   :  { %1762 = vmatpush3.bf16.msra.mxu1 %v1829_v61 }
 0x140   :  { %1763 = vmatprep.subr.bf16.mxu1 %v1830_v62 }
 0x143   :  { %1764 = vmatpush3.bf16.msra.mxu1 %v1830_v62 }
 0x144   :  { %1765 = vmatprep.subr.bf16.mxu1 %v1831_v63 }
 0x147   :  { %1766 = vmatpush3.bf16.msra.mxu1 %v1831_v63 }
 0x1d3   :  { %v1675_v1 = vpop.f32.mrb[0].mxu1 }
 0x1d4   :  { %v475_v2 = vadd.f32 %v1675_v1, %v2240_v0  ;;  %v466_v3 = vpop.f32.mrb[1].mxu1 }
 0x1d5   :  { %v467_v4 = vadd.f32 %v2240_v0, %v466_v3  ;;  %v1676_v5 = vpop.f32.mrb[2].mxu1 }
 0x1d6   :  { %v478_v6 = vadd.f32 %v1676_v5, %v2240_v0  ;;  %v469_v8 = vpop.f32.mrb[3].mxu1  ;;  %v595_v10 = vmax.f32 %v475_v2, 0.0 }
 0x1d7   :  { %v470_v9 = vadd.f32 %v2240_v0, %v469_v8  ;;  %v593_v12 = vmax.f32 %v467_v4, 0.0 }
 0x1d8   :  { %v596_v11 = vmax.f32 %v478_v6, 0.0 }
 0x1d9   :  { %v594_v13 = vmax.f32 %v470_v9, 0.0 }
 0x1da   :  { %v626_v14 = vpack.c.bf16 %v596_v11, %v595_v10 }
 0x1db   :  { %v625_v15 = vpack.c.bf16 %v594_v13, %v593_v12  ;;  %v1679_v16 = vpop.f32.mrb[4].mxu1 }
 0x1dc   :  { %v491_v17 = vadd.f32 %v1679_v16, %v2240_v0  ;;  %v482_v18 = vpop.f32.mrb[5].mxu1 }
 0x1dd   :  { %v483_v19 = vadd.f32 %v2240_v0, %v482_v18  ;;  %v1680_v20 = vpop.f32.mrb[6].mxu1  ;;  %1721 = vmatprep.mubr.bf16.mxu0 %v625_v15 }
 0x1de   :  { %v494_v21 = vadd.f32 %v1680_v20, %v2240_v0  ;;  %v485_v22 = vpop.f32.mrb[7].mxu1  ;;  %1722 = vmatmul.mubr.bf16.vlgmr.msra.gmra.mrb[32].mxu0 %v626_v14  ;;  %v599_v24 = vmax.f32 %v491_v17, 0.0 }
 0x1df   :  { %v486_v23 = vadd.f32 %v2240_v0, %v485_v22  ;;  %v597_v26 = vmax.f32 %v483_v19, 0.0 }
 0x1e0   :  { %v600_v25 = vmax.f32 %v494_v21, 0.0 }
 0x1e1   :  { %v598_v27 = vmax.f32 %v486_v23, 0.0 }
 0x1e2   :  { %v628_v28 = vpack.c.bf16 %v600_v25, %v599_v24 }
 0x1e3   :  { %v627_v29 = vpack.c.bf16 %v598_v27, %v597_v26  ;;  %v1683_v30 = vpop.f32.mrb[8].mxu1 }
 0x1e4   :  { %v507_v31 = vadd.f32 %v1683_v30, %v2240_v0  ;;  %v498_v32 = vpop.f32.mrb[9].mxu1 }
 0x1e5   :  { %v499_v33 = vadd.f32 %v2240_v0, %v498_v32  ;;  %v1684_v34 = vpop.f32.mrb[10].mxu1  ;;  %1725 = vmatprep.mubr.bf16.mxu0 %v627_v29 }
 0x1e6   :  { %v510_v35 = vadd.f32 %v1684_v34, %v2240_v0  ;;  %v501_v36 = vpop.f32.mrb[11].mxu1  ;;  %1726 = vmatmul.mubr.bf16.gmra.mrb[36].mxu0 %v628_v28  ;;  %v603_v38 = vmax.f32 %v507_v31, 0.0 }
 0x1e7   :  { %v502_v37 = vadd.f32 %v2240_v0, %v501_v36  ;;  %v601_v40 = vmax.f32 %v499_v33, 0.0 }
 0x1e8   :  { %v604_v39 = vmax.f32 %v510_v35, 0.0 }
 0x1e9   :  { %v602_v41 = vmax.f32 %v502_v37, 0.0 }
 0x1ea   :  { %v630_v42 = vpack.c.bf16 %v604_v39, %v603_v38 }
 0x1eb   :  { %v629_v43 = vpack.c.bf16 %v602_v41, %v601_v40  ;;  %v1687_v44 = vpop.f32.mrb[12].mxu1 }
 0x1ec   :  { %v523_v45 = vadd.f32 %v1687_v44, %v2240_v0  ;;  %v514_v46 = vpop.f32.mrb[13].mxu1 }
 0x1ed   :  { %v515_v47 = vadd.f32 %v2240_v0, %v514_v46  ;;  %v1688_v48 = vpop.f32.mrb[14].mxu1  ;;  %1729 = vmatprep.mubr.bf16.mxu0 %v629_v43 }
 0x1ee   :  { %v526_v49 = vadd.f32 %v1688_v48, %v2240_v0  ;;  %v517_v50 = vpop.f32.mrb[15].mxu1  ;;  %1730 = vmatmul.mubr.bf16.gmra.mrb[40].mxu0 %v630_v42  ;;  %v607_v52 = vmax.f32 %v523_v45, 0.0 }
 0x1ef   :  { %v518_v51 = vadd.f32 %v2240_v0, %v517_v50  ;;  %v605_v54 = vmax.f32 %v515_v47, 0.0 }
 0x1f0   :  { %v608_v53 = vmax.f32 %v526_v49, 0.0 }
 0x1f1   :  { %v606_v55 = vmax.f32 %v518_v51, 0.0  ;;  %v1832_v51 = vld [vmem:[%s2708_s7 + $0x38] sm:$0xff]  }
 0x1f2   :  { %v632_v56 = vpack.c.bf16 %v608_v53, %v607_v52  ;;  %1767 = vmatprep.subr.bf16.mxu1 %v1832_v51  ;;  %v2280_v52 = vld [vmem:[%s2710_s6] ss:$0 sm:$0xff] }
 0x1f3   :  { %v631_v57 = vpack.c.bf16 %v606_v55, %v605_v54  ;;  %v1691_v58 = vpop.f32.mrb[16].mxu1  ;;  %1768 = vmatpush3.bf16.msra.mxu1 %v1832_v51 }
 0x1f4   :  { %v539_v7 = vadd.f32 %v1691_v58, %v2240_v0  ;;  %v530_v59 = vpop.f32.mrb[17].mxu1 }
 0x1f5   :  { %v531_v60 = vadd.f32 %v2240_v0, %v530_v59  ;;  %v1692_v61 = vpop.f32.mrb[18].mxu1  ;;  %1733 = vmatprep.mubr.bf16.mxu0 %v631_v57 }
 0x1f6   :  { %v542_v62 = vadd.f32 %v1692_v61, %v2240_v0  ;;  %v533_v63 = vpop.f32.mrb[19].mxu1  ;;  %1734 = vmatmul.mubr.bf16.gmra.mrb[44].mxu0 %v632_v56  ;;  %v611_v2 = vmax.f32 %v539_v7, 0.0 }
 0x1f7   :  { %v534_v1 = vadd.f32 %v2240_v0, %v533_v63  ;;  %v609_v4 = vmax.f32 %v531_v60, 0.0 }
 0x1f8   :  { %v612_v3 = vmax.f32 %v542_v62, 0.0 }
 0x1f9   :  { %v610_v5 = vmax.f32 %v534_v1, 0.0 }
 0x1fa   :  { %v634_v6 = vpack.c.bf16 %v612_v3, %v611_v2 }
 0x1fb   :  { %v633_v8 = vpack.c.bf16 %v610_v5, %v609_v4  ;;  %v1695_v9 = vpop.f32.mrb[20].mxu1 }
 0x1fc   :  { %v555_v10 = vadd.f32 %v1695_v9, %v2240_v0  ;;  %v546_v11 = vpop.f32.mrb[21].mxu1 }
 0x1fd   :  { %v547_v12 = vadd.f32 %v2240_v0, %v546_v11  ;;  %v1696_v13 = vpop.f32.mrb[22].mxu1  ;;  %1737 = vmatprep.mubr.bf16.mxu0 %v633_v8 }
 0x1fe   :  { %v558_v14 = vadd.f32 %v1696_v13, %v2240_v0  ;;  %v549_v15 = vpop.f32.mrb[23].mxu1  ;;  %1738 = vmatmul.mubr.bf16.gmra.mrb[48].mxu0 %v634_v6  ;;  %v615_v17 = vmax.f32 %v555_v10, 0.0 }
 0x1ff   :  { %v550_v16 = vadd.f32 %v2240_v0, %v549_v15  ;;  %v613_v19 = vmax.f32 %v547_v12, 0.0 }
 0x200   :  { %v616_v18 = vmax.f32 %v558_v14, 0.0 }
 0x201   :  { %v614_v20 = vmax.f32 %v550_v16, 0.0 }
 0x202   :  { %v636_v21 = vpack.c.bf16 %v616_v18, %v615_v17 }
 0x203   :  { %v635_v22 = vpack.c.bf16 %v614_v20, %v613_v19  ;;  %v1699_v23 = vpop.f32.mrb[24].mxu1 }
 0x204   :  { %v571_v24 = vadd.f32 %v1699_v23, %v2240_v0  ;;  %v562_v25 = vpop.f32.mrb[25].mxu1 }
 0x205   :  { %v563_v26 = vadd.f32 %v2240_v0, %v562_v25  ;;  %v1700_v27 = vpop.f32.mrb[26].mxu1  ;;  %1741 = vmatprep.mubr.bf16.mxu0 %v635_v22 }
 0x206   :  { %v574_v28 = vadd.f32 %v1700_v27, %v2240_v0  ;;  %v565_v29 = vpop.f32.mrb[27].mxu1  ;;  %1742 = vmatmul.mubr.bf16.gmra.mrb[52].mxu0 %v636_v21  ;;  %v619_v31 = vmax.f32 %v571_v24, 0.0 }
 0x207   :  { %v566_v30 = vadd.f32 %v2240_v0, %v565_v29  ;;  %v617_v33 = vmax.f32 %v563_v26, 0.0 }
 0x208   :  { %v620_v32 = vmax.f32 %v574_v28, 0.0 }
 0x209   :  { %v618_v34 = vmax.f32 %v566_v30, 0.0 }
 0x20a   :  { %v638_v35 = vpack.c.bf16 %v620_v32, %v619_v31 }
 0x20b   :  { %v637_v36 = vpack.c.bf16 %v618_v34, %v617_v33  ;;  %v1703_v37 = vpop.f32.mrb[28].mxu1 }
 0x20c   :  { %v587_v38 = vadd.f32 %v1703_v37, %v2240_v0  ;;  %v578_v39 = vpop.f32.mrb[29].mxu1 }
 0x20d   :  { %v579_v40 = vadd.f32 %v2240_v0, %v578_v39  ;;  %v1704_v41 = vpop.f32.mrb[30].mxu1  ;;  %1745 = vmatprep.mubr.bf16.mxu0 %v637_v36 }
 0x20e   :  { %v590_v42 = vadd.f32 %v1704_v41, %v2240_v0  ;;  %v581_v43 = vpop.f32.mrb[31].mxu1  ;;  %1746 = vmatmul.mubr.bf16.gmra.mrb[56].mxu0 %v638_v35  ;;  %v623_v45 = vmax.f32 %v587_v38, 0.0 }
 0x20f   :  { %v582_v44 = vadd.f32 %v2240_v0, %v581_v43  ;;  %v621_v47 = vmax.f32 %v579_v40, 0.0 }
 0x210   :  { %v624_v46 = vmax.f32 %v590_v42, 0.0 }
 0x211   :  { %v622_v48 = vmax.f32 %v582_v44, 0.0 }
 0x212   :  { %v640_v49 = vpack.c.bf16 %v624_v46, %v623_v45 }
 0x213   :  { %v639_v50 = vpack.c.bf16 %v622_v48, %v621_v47 }
 0x215   :  { %1749 = vmatprep.mubr.bf16.mxu0 %v639_v50 }
 0x216   :  { %1750 = vmatmul.mubr.bf16.gmra.mrb[60].mxu0 %v640_v49 }
 0x2b1   :  { %v1723_v0 = vpop.f32.mrb[32].mxu0 }
 0x2b2   :  { %v755_v53 = vadd.f32 %v1723_v0, %v2280_v52  ;;  %v746_v54 = vpop.f32.mrb[33].mxu0 }
 0x2b3   :  { %v747_v55 = vadd.f32 %v2280_v52, %v746_v54  ;;  %v1724_v56 = vpop.f32.mrb[34].mxu0 }
 0x2b4   :  { %v758_v57 = vadd.f32 %v1724_v56, %v2280_v52  ;;  %v749_v58 = vpop.f32.mrb[35].mxu0  ;;  %v875_v59 = vmax.f32 %v755_v53, 0.0 }
 0x2b5   :  { %v750_v7 = vadd.f32 %v2280_v52, %v749_v58  ;;  %v873_v61 = vmax.f32 %v747_v55, 0.0 }
 0x2b6   :  { %v876_v60 = vmax.f32 %v758_v57, 0.0 }
 0x2b7   :  { %v874_v62 = vmax.f32 %v750_v7, 0.0 }
 0x2b8   :  { %v906_v63 = vpack.c.bf16 %v876_v60, %v875_v59 }
 0x2b9   :  { %v905_v1 = vpack.c.bf16 %v874_v62, %v873_v61  ;;  %v1727_v2 = vpop.f32.mrb[36].mxu0 }
 0x2ba   :  { %v771_v3 = vadd.f32 %v1727_v2, %v2280_v52  ;;  %v762_v4 = vpop.f32.mrb[37].mxu0 }
 0x2bb   :  { %v763_v5 = vadd.f32 %v2280_v52, %v762_v4  ;;  %v1728_v6 = vpop.f32.mrb[38].mxu0  ;;  %1769 = vmatprep.mubr.bf16.mxu1 %v905_v1 }
 0x2bc   :  { %v774_v8 = vadd.f32 %v1728_v6, %v2280_v52  ;;  %v765_v9 = vpop.f32.mrb[39].mxu0  ;;  %1770 = vmatmul.mubr.bf16.vlgmr.msra.gmra.mrb[32].mxu1 %v906_v63  ;;  %v879_v11 = vmax.f32 %v771_v3, 0.0 }
 0x2bd   :  { %v766_v10 = vadd.f32 %v2280_v52, %v765_v9  ;;  %v877_v13 = vmax.f32 %v763_v5, 0.0 }
 0x2be   :  { %v880_v12 = vmax.f32 %v774_v8, 0.0 }
 0x2bf   :  { %v878_v14 = vmax.f32 %v766_v10, 0.0 }
 0x2c0   :  { %v908_v15 = vpack.c.bf16 %v880_v12, %v879_v11 }
 0x2c1   :  { %v907_v16 = vpack.c.bf16 %v878_v14, %v877_v13  ;;  %v1731_v17 = vpop.f32.mrb[40].mxu0 }
 0x2c2   :  { %v787_v18 = vadd.f32 %v1731_v17, %v2280_v52  ;;  %v778_v19 = vpop.f32.mrb[41].mxu0 }
 0x2c3   :  { %v779_v20 = vadd.f32 %v2280_v52, %v778_v19  ;;  %v1732_v21 = vpop.f32.mrb[42].mxu0  ;;  %1773 = vmatprep.mubr.bf16.mxu1 %v907_v16 }
 0x2c4   :  { %v790_v22 = vadd.f32 %v1732_v21, %v2280_v52  ;;  %v781_v23 = vpop.f32.mrb[43].mxu0  ;;  %1774 = vmatmul.mubr.bf16.gmra.mrb[36].mxu1 %v908_v15  ;;  %v883_v25 = vmax.f32 %v787_v18, 0.0 }
 0x2c5   :  { %v782_v24 = vadd.f32 %v2280_v52, %v781_v23  ;;  %v881_v27 = vmax.f32 %v779_v20, 0.0 }
 0x2c6   :  { %v884_v26 = vmax.f32 %v790_v22, 0.0 }
 0x2c7   :  { %v882_v28 = vmax.f32 %v782_v24, 0.0 }
 0x2c8   :  { %v910_v29 = vpack.c.bf16 %v884_v26, %v883_v25 }
 0x2c9   :  { %v909_v30 = vpack.c.bf16 %v882_v28, %v881_v27  ;;  %v1735_v31 = vpop.f32.mrb[44].mxu0 }
 0x2ca   :  { %v803_v32 = vadd.f32 %v1735_v31, %v2280_v52  ;;  %v794_v33 = vpop.f32.mrb[45].mxu0 }
 0x2cb   :  { %v795_v34 = vadd.f32 %v2280_v52, %v794_v33  ;;  %v1736_v35 = vpop.f32.mrb[46].mxu0  ;;  %1777 = vmatprep.mubr.bf16.mxu1 %v909_v30 }
 0x2cc   :  { %v806_v36 = vadd.f32 %v1736_v35, %v2280_v52  ;;  %v797_v37 = vpop.f32.mrb[47].mxu0  ;;  %1778 = vmatmul.mubr.bf16.gmra.mrb[40].mxu1 %v910_v29  ;;  %v887_v39 = vmax.f32 %v803_v32, 0.0 }
 0x2cd   :  { %v798_v38 = vadd.f32 %v2280_v52, %v797_v37  ;;  %v885_v41 = vmax.f32 %v795_v34, 0.0 }
 0x2ce   :  { %v888_v40 = vmax.f32 %v806_v36, 0.0 }
 0x2cf   :  { %v886_v42 = vmax.f32 %v798_v38, 0.0  ;;  %v2317_v38 = vld [vmem:[%s2711_s8] ss:$0 sm:$0xff] }
 0x2d0   :  { %v912_v43 = vpack.c.bf16 %v888_v40, %v887_v39 }
 0x2d1   :  { %v911_v44 = vpack.c.bf16 %v886_v42, %v885_v41  ;;  %v1739_v45 = vpop.f32.mrb[48].mxu0 }
 0x2d2   :  { %v819_v46 = vadd.f32 %v1739_v45, %v2280_v52  ;;  %v810_v47 = vpop.f32.mrb[49].mxu0 }
 0x2d3   :  { %v811_v48 = vadd.f32 %v2280_v52, %v810_v47  ;;  %v1740_v49 = vpop.f32.mrb[50].mxu0  ;;  %1781 = vmatprep.mubr.bf16.mxu1 %v911_v44 }
 0x2d4   :  { %v822_v50 = vadd.f32 %v1740_v49, %v2280_v52  ;;  %v813_v51 = vpop.f32.mrb[51].mxu0  ;;  %1782 = vmatmul.mubr.bf16.gmra.mrb[44].mxu1 %v912_v43  ;;  %v891_v53 = vmax.f32 %v819_v46, 0.0 }
 0x2d5   :  { %v814_v0 = vadd.f32 %v2280_v52, %v813_v51  ;;  %v889_v55 = vmax.f32 %v811_v48, 0.0 }
 0x2d6   :  { %v892_v54 = vmax.f32 %v822_v50, 0.0 }
 0x2d7   :  { %v890_v56 = vmax.f32 %v814_v0, 0.0 }
 0x2d8   :  { %v914_v57 = vpack.c.bf16 %v892_v54, %v891_v53 }
 0x2d9   :  { %v913_v58 = vpack.c.bf16 %v890_v56, %v889_v55  ;;  %v1743_v7 = vpop.f32.mrb[52].mxu0 }
 0x2da   :  { %v835_v59 = vadd.f32 %v1743_v7, %v2280_v52  ;;  %v826_v60 = vpop.f32.mrb[53].mxu0 }
 0x2db   :  { %v827_v61 = vadd.f32 %v2280_v52, %v826_v60  ;;  %v1744_v62 = vpop.f32.mrb[54].mxu0  ;;  %1785 = vmatprep.mubr.bf16.mxu1 %v913_v58 }
 0x2dc   :  { %v838_v63 = vadd.f32 %v1744_v62, %v2280_v52  ;;  %v829_v1 = vpop.f32.mrb[55].mxu0  ;;  %1786 = vmatmul.mubr.bf16.gmra.mrb[48].mxu1 %v914_v57  ;;  %v895_v3 = vmax.f32 %v835_v59, 0.0 }
 0x2dd   :  { %v830_v2 = vadd.f32 %v2280_v52, %v829_v1  ;;  %v893_v5 = vmax.f32 %v827_v61, 0.0 }
 0x2de   :  { %v896_v4 = vmax.f32 %v838_v63, 0.0 }
 0x2df   :  { %v894_v6 = vmax.f32 %v830_v2, 0.0 }
 0x2e0   :  { %v916_v8 = vpack.c.bf16 %v896_v4, %v895_v3 }
 0x2e1   :  { %v915_v9 = vpack.c.bf16 %v894_v6, %v893_v5  ;;  %v1747_v10 = vpop.f32.mrb[56].mxu0 }
 0x2e2   :  { %v851_v11 = vadd.f32 %v1747_v10, %v2280_v52  ;;  %v842_v12 = vpop.f32.mrb[57].mxu0 }
 0x2e3   :  { %v843_v13 = vadd.f32 %v2280_v52, %v842_v12  ;;  %v1748_v14 = vpop.f32.mrb[58].mxu0  ;;  %1789 = vmatprep.mubr.bf16.mxu1 %v915_v9 }
 0x2e4   :  { %v854_v15 = vadd.f32 %v1748_v14, %v2280_v52  ;;  %v845_v16 = vpop.f32.mrb[59].mxu0  ;;  %1790 = vmatmul.mubr.bf16.gmra.mrb[52].mxu1 %v916_v8  ;;  %v899_v18 = vmax.f32 %v851_v11, 0.0 }
 0x2e5   :  { %v846_v17 = vadd.f32 %v2280_v52, %v845_v16  ;;  %v897_v20 = vmax.f32 %v843_v13, 0.0 }
 0x2e6   :  { %v900_v19 = vmax.f32 %v854_v15, 0.0 }
 0x2e7   :  { %v898_v21 = vmax.f32 %v846_v17, 0.0 }
 0x2e8   :  { %v918_v22 = vpack.c.bf16 %v900_v19, %v899_v18 }
 0x2e9   :  { %v917_v23 = vpack.c.bf16 %v898_v21, %v897_v20  ;;  %v1751_v24 = vpop.f32.mrb[60].mxu0 }
 0x2ea   :  { %v867_v25 = vadd.f32 %v1751_v24, %v2280_v52  ;;  %v858_v26 = vpop.f32.mrb[61].mxu0 }
 0x2eb   :  { %v859_v27 = vadd.f32 %v2280_v52, %v858_v26  ;;  %v1752_v28 = vpop.f32.mrb[62].mxu0  ;;  %1793 = vmatprep.mubr.bf16.mxu1 %v917_v23 }
 0x2ec   :  { %v870_v29 = vadd.f32 %v1752_v28, %v2280_v52  ;;  %v861_v30 = vpop.f32.mrb[63].mxu0  ;;  %1794 = vmatmul.mubr.bf16.gmra.mrb[56].mxu1 %v918_v22  ;;  %v903_v32 = vmax.f32 %v867_v25, 0.0 }
 0x2ed   :  { %v862_v31 = vadd.f32 %v2280_v52, %v861_v30  ;;  %v901_v34 = vmax.f32 %v859_v27, 0.0 }
 0x2ee   :  { %v904_v33 = vmax.f32 %v870_v29, 0.0 }
 0x2ef   :  { %v902_v35 = vmax.f32 %v862_v31, 0.0 }
 0x2f0   :  { %v920_v36 = vpack.c.bf16 %v904_v33, %v903_v32 }
 0x2f1   :  { %v919_v37 = vpack.c.bf16 %v902_v35, %v901_v34 }
 0x2f3   :  { %1797 = vmatprep.mubr.bf16.mxu1 %v919_v37 }
 0x2f4   :  { %1798 = vmatmul.mubr.bf16.gmra.mrb[60].mxu1 %v920_v36 }
 0x38f   :  { %v1771_v39 = vpop.f32.mrb[32].mxu1 }
 0x390   :  { %v2320_v40 = vadd.f32 %v1771_v39, %v2317_v38  ;;  %v1026_v41 = vpop.f32.mrb[33].mxu1 }
 0x391   :  { %v2323_v52 = vadd.f32 %v2317_v38, %v1026_v41  ;;  %v1772_v42 = vpop.f32.mrb[34].mxu1 }
 0x392   :  { %1157 = vmax.xlane.f32.xlu1 %v2320_v40  ;;  %v1029_v43 = vpop.f32.mrb[35].mxu1  ;;  %v2328_v44 = vadd.f32 %v1772_v42, %v2317_v38 }
 0x393   :  { %1153 = vmax.xlane.f32.xlu0 %v2323_v52  ;;  %v2331_v45 = vadd.f32 %v2317_v38, %v1029_v43 }
 0x396   :  { %1159 = vmax.xlane.f32.xlu1 %v2328_v44 }
 0x397   :  { %v1775_v46 = vpop.f32.mrb[36].mxu1  ;;  %1155 = vmax.xlane.f32.xlu0 %v2331_v45 }
 0x398   :  { %v2336_v47 = vadd.f32 %v1775_v46, %v2317_v38  ;;  %v1042_v48 = vpop.f32.mrb[37].mxu1 }
 0x399   :  { %v1776_v49 = vpop.f32.mrb[38].mxu1  ;;  %v2344_v0 = vadd.f32 %v2317_v38, %v1042_v48 }
 0x39a   :  { %v2339_v50 = vadd.f32 %v1776_v49, %v2317_v38  ;;  %v1045_v51 = vpop.f32.mrb[39].mxu1 }
 0x39b   :  { %1165 = vmax.xlane.f32.xlu0 %v2336_v47  ;;  %v2347_v53 = vadd.f32 %v2317_v38, %v1045_v51 }
 0x39c   :  { %1167 = vmax.xlane.f32.xlu1 %v2339_v50 }
 0x39f   :  { %v1779_v54 = vpop.f32.mrb[40].mxu1  ;;  %1161 = vmax.xlane.f32.xlu0 %v2344_v0 }
 0x3a0   :  { %v2351_v55 = vadd.f32 %v1779_v54, %v2317_v38  ;;  %v1058_v56 = vpop.f32.mrb[41].mxu1  ;;  %1163 = vmax.xlane.f32.xlu1 %v2347_v53 }
 0x3a1   :  { %v1780_v57 = vpop.f32.mrb[42].mxu1  ;;  %v2360_v59 = vadd.f32 %v2317_v38, %v1058_v56 }
 0x3a2   :  { %v2355_v58 = vadd.f32 %v1780_v57, %v2317_v38  ;;  %v1061_v7 = vpop.f32.mrb[43].mxu1 }
 0x3a3   :  { %1173 = vmax.xlane.f32.xlu0 %v2351_v55  ;;  %v2363_v60 = vadd.f32 %v2317_v38, %v1061_v7 }
 0x3a4   :  { %1175 = vmax.xlane.f32.xlu1 %v2355_v58 }
 0x3a7   :  { %v1783_v61 = vpop.f32.mrb[44].mxu1  ;;  %1169 = vmax.xlane.f32.xlu0 %v2360_v59 }
 0x3a8   :  { %v2367_v62 = vadd.f32 %v1783_v61, %v2317_v38  ;;  %v1074_v63 = vpop.f32.mrb[45].mxu1  ;;  %1171 = vmax.xlane.f32.xlu1 %v2363_v60 }
 0x3a9   :  { %v1784_v1 = vpop.f32.mrb[46].mxu1  ;;  %v2376_v4 = vadd.f32 %v2317_v38, %v1074_v63 }
 0x3aa   :  { %v2371_v2 = vadd.f32 %v1784_v1, %v2317_v38  ;;  %v1077_v3 = vpop.f32.mrb[47].mxu1 }
 0x3ab   :  { %1181 = vmax.xlane.f32.xlu0 %v2367_v62  ;;  %v2379_v5 = vadd.f32 %v2317_v38, %v1077_v3 }
 0x3ac   :  { %1183 = vmax.xlane.f32.xlu1 %v2371_v2 }
 0x3af   :  { %v1787_v6 = vpop.f32.mrb[48].mxu1  ;;  %1177 = vmax.xlane.f32.xlu0 %v2376_v4 }
 0x3b0   :  { %v2383_v8 = vadd.f32 %v1787_v6, %v2317_v38  ;;  %v1090_v9 = vpop.f32.mrb[49].mxu1  ;;  %1179 = vmax.xlane.f32.xlu1 %v2379_v5 }
 0x3b1   :  { %v1788_v10 = vpop.f32.mrb[50].mxu1  ;;  %v2392_v13 = vadd.f32 %v2317_v38, %v1090_v9 }
 0x3b2   :  { %v2387_v11 = vadd.f32 %v1788_v10, %v2317_v38  ;;  %v1093_v12 = vpop.f32.mrb[51].mxu1 }
 0x3b3   :  { %1189 = vmax.xlane.f32.xlu0 %v2383_v8  ;;  %v2395_v14 = vadd.f32 %v2317_v38, %v1093_v12 }
 0x3b4   :  { %1191 = vmax.xlane.f32.xlu1 %v2387_v11 }
 0x3b7   :  { %v1791_v15 = vpop.f32.mrb[52].mxu1  ;;  %1185 = vmax.xlane.f32.xlu0 %v2392_v13 }
 0x3b8   :  { %v2399_v16 = vadd.f32 %v1791_v15, %v2317_v38  ;;  %v1106_v17 = vpop.f32.mrb[53].mxu1  ;;  %1187 = vmax.xlane.f32.xlu1 %v2395_v14 }
 0x3b9   :  { %v1792_v18 = vpop.f32.mrb[54].mxu1  ;;  %v2408_v21 = vadd.f32 %v2317_v38, %v1106_v17 }
 0x3ba   :  { %v2403_v19 = vadd.f32 %v1792_v18, %v2317_v38  ;;  %v1109_v20 = vpop.f32.mrb[55].mxu1 }
 0x3bb   :  { %1197 = vmax.xlane.f32.xlu0 %v2399_v16  ;;  %v2411_v22 = vadd.f32 %v2317_v38, %v1109_v20 }
 0x3bc   :  { %1199 = vmax.xlane.f32.xlu1 %v2403_v19 }
 0x3bf   :  { %v1795_v23 = vpop.f32.mrb[56].mxu1  ;;  %1193 = vmax.xlane.f32.xlu0 %v2408_v21 }
 0x3c0   :  { %v2415_v24 = vadd.f32 %v1795_v23, %v2317_v38  ;;  %v1122_v25 = vpop.f32.mrb[57].mxu1  ;;  %1195 = vmax.xlane.f32.xlu1 %v2411_v22 }
 0x3c1   :  { %v1796_v26 = vpop.f32.mrb[58].mxu1  ;;  %v2424_v29 = vadd.f32 %v2317_v38, %v1122_v25 }
 0x3c2   :  { %v2419_v27 = vadd.f32 %v1796_v26, %v2317_v38  ;;  %v1125_v28 = vpop.f32.mrb[59].mxu1 }
 0x3c3   :  { %1205 = vmax.xlane.f32.xlu0 %v2415_v24  ;;  %v2427_v30 = vadd.f32 %v2317_v38, %v1125_v28 }
 0x3c4   :  { %1207 = vmax.xlane.f32.xlu1 %v2419_v27 }
 0x3c7   :  { %v1799_v31 = vpop.f32.mrb[60].mxu1  ;;  %1201 = vmax.xlane.f32.xlu0 %v2424_v29 }
 0x3c8   :  { %v1138_v32 = vpop.f32.mrb[61].mxu1  ;;  %1203 = vmax.xlane.f32.xlu1 %v2427_v30  ;;  %v2439_v37 = vadd.f32 %v1799_v31, %v2317_v38 }
 0x3c9   :  { %v2432_v33 = vadd.f32 %v2317_v38, %v1138_v32  ;;  %v1800_v34 = vpop.f32.mrb[62].mxu1 }
 0x3ca   :  { %v1141_v35 = vpop.f32.mrb[63].mxu1  ;;  %v2443_v39 = vadd.f32 %v1800_v34, %v2317_v38 }
 0x3cb   :  { %v2435_v36 = vadd.f32 %v2317_v38, %v1141_v35  ;;  %1209 = vmax.xlane.f32.xlu0 %v2432_v33 }
 0x3cd   :  { %1211 = vmax.xlane.f32.xlu1 %v2435_v36 }
 0x3cf   :  { %1213 = vmax.xlane.f32.xlu0 %v2439_v37 }
 0x3d1   :  { %1215 = vmax.xlane.f32.xlu1 %v2443_v39 }
 0x41f   :  { %v1158_v41 = vpop.xlane.xlu1 %1157 }
 0x420   :  { %v1219_v42 = vsub.f32 %v2320_v40, %v1158_v41  ;;  %v1154_v43 = vpop.xlane.xlu0 %1153 }
 0x421   :  { %v1217_v46 = vsub.f32 %v2323_v52, %v1154_v43 }
 0x422   :  { %v1253_v48 = vmul.f32 1.442695, %v1219_v42 }
 0x423   :  { %v1249_v49 = vmul.f32 1.442695, %v1217_v46  ;;  %v1160_v51 = vpop.xlane.xlu1 %1159 }
 0x424   :  { %1833 = vpow2.f32 %v1253_v48  ;;  %v1220_v54 = vsub.f32 %v2328_v44, %v1160_v51  ;;  %v1156_v56 = vpop.xlane.xlu0 %1155 }
 0x425   :  { %v1218_v38 = vsub.f32 %v2331_v45, %v1156_v56  ;;  %1835 = vpow2.f32 %v1249_v49 }
 0x426   :  { %v1255_v57 = vmul.f32 1.442695, %v1220_v54 }
 0x427   :  { %v1251_v7 = vmul.f32 1.442695, %v1218_v38 }
 0x428   :  { %1837 = vpow2.f32 %v1255_v57  ;;  %v1166_v61 = vpop.xlane.xlu0 %1165 }
 0x429   :  { %v1223_v63 = vsub.f32 %v2336_v47, %v1166_v61  ;;  %v1168_v40 = vpop.xlane.xlu1 %1167  ;;  %1839 = vpow2.f32 %v1251_v7 }
 0x42a   :  { %v1224_v1 = vsub.f32 %v2339_v50, %v1168_v40 }
 0x42b   :  { %v1261_v52 = vmul.f32 1.442695, %v1223_v63 }
 0x42c   :  { %v1263_v3 = vmul.f32 1.442695, %v1224_v1  ;;  %v1162_v6 = vpop.xlane.xlu0 %1161 }
 0x42d   :  { %1841 = vpow2.f32 %v1261_v52  ;;  %v1221_v44 = vsub.f32 %v2344_v0, %v1162_v6  ;;  %v1164_v9 = vpop.xlane.xlu1 %1163 }
 0x42e   :  { %v2454_v10 = vpop.eup %1833  ;;  %v1222_v45 = vsub.f32 %v2347_v53, %v1164_v9  ;;  %1843 = vpow2.f32 %v1263_v3 }
 0x42f   :  { %v1257_v12 = vmul.f32 1.442695, %v1221_v44  ;;  %1317 = vadd.xlane.f32.xlu0 %v2454_v10  ;;  %v2458_v17 = vpop.eup %1835 }
 0x430   :  { %v1259_v47 = vmul.f32 1.442695, %v1222_v45  ;;  %v1174_v15 = vpop.xlane.xlu0 %1173 }
 0x431   :  { %1845 = vpow2.f32 %v1257_v12  ;;  %v1227_v50 = vsub.f32 %v2351_v55, %v1174_v15  ;;  %v1176_v18 = vpop.xlane.xlu1 %1175 }
 0x432   :  { %v2461_v20 = vpop.eup %1837  ;;  %v1228_v0 = vsub.f32 %v2355_v58, %v1176_v18  ;;  %1847 = vpow2.f32 %v1259_v47 }
 0x433   :  { %v1269_v23 = vmul.f32 1.442695, %v1227_v50  ;;  %1319 = vadd.xlane.f32.xlu1 %v2461_v20  ;;  %1313 = vadd.xlane.f32.xlu0 %v2458_v17  ;;  %v2467_v31 = vpop.eup %1839 }
 0x434   :  { %v1271_v53 = vmul.f32 1.442695, %v1228_v0  ;;  %v1170_v25 = vpop.xlane.xlu0 %1169 }
 0x435   :  { %1849 = vpow2.f32 %v1269_v23  ;;  %v1225_v26 = vsub.f32 %v2360_v59, %v1170_v25  ;;  %v1172_v28 = vpop.xlane.xlu1 %1171 }
 0x436   :  { %v1226_v55 = vsub.f32 %v2363_v60, %v1172_v28  ;;  %1851 = vpow2.f32 %v1271_v53 }
 0x437   :  { %v2470_v32 = vpop.eup %1841  ;;  %v1265_v34 = vmul.f32 1.442695, %v1225_v26  ;;  %1315 = vadd.xlane.f32.xlu1 %v2467_v31 }
 0x438   :  { %v1267_v58 = vmul.f32 1.442695, %v1226_v55  ;;  %1325 = vadd.xlane.f32.xlu0 %v2470_v32  ;;  %v1182_v35 = vpop.xlane.xlu0 %1181  ;;  %v2475_v59 = vpop.eup %1843 }
 0x439   :  { %1853 = vpow2.f32 %v1265_v34  ;;  %v1231_v41 = vsub.f32 %v2367_v62, %v1182_v35  ;;  %v1184_v42 = vpop.xlane.xlu1 %1183 }
 0x43a   :  { %v1232_v43 = vsub.f32 %v2371_v2, %v1184_v42  ;;  %1855 = vpow2.f32 %v1267_v58 }
 0x43b   :  { %v2478_v46 = vpop.eup %1845  ;;  %v1277_v60 = vmul.f32 1.442695, %v1231_v41  ;;  %1327 = vadd.xlane.f32.xlu1 %v2475_v59 }
 0x43c   :  { %v1279_v48 = vmul.f32 1.442695, %v1232_v43  ;;  %1321 = vadd.xlane.f32.xlu0 %v2478_v46  ;;  %v1178_v49 = vpop.xlane.xlu0 %1177  ;;  %v2483_v62 = vpop.eup %1847 }
 0x43d   :  { %1857 = vpow2.f32 %v1277_v60  ;;  %v1229_v51 = vsub.f32 %v2376_v4, %v1178_v49  ;;  %v1180_v54 = vpop.xlane.xlu1 %1179 }
 0x43e   :  { %v1230_v56 = vsub.f32 %v2379_v5, %v1180_v54  ;;  %1859 = vpow2.f32 %v1279_v48 }
 0x43f   :  { %v2486_v38 = vpop.eup %1849  ;;  %v1273_v2 = vmul.f32 1.442695, %v1229_v51  ;;  %1323 = vadd.xlane.f32.xlu1 %v2483_v62 }
 0x440   :  { %v1275_v57 = vmul.f32 1.442695, %v1230_v56  ;;  %1333 = vadd.xlane.f32.xlu0 %v2486_v38  ;;  %v1190_v7 = vpop.xlane.xlu0 %1189  ;;  %v2491_v4 = vpop.eup %1851 }
 0x441   :  { %1861 = vpow2.f32 %v1273_v2  ;;  %v1235_v61 = vsub.f32 %v2383_v8, %v1190_v7  ;;  %v1192_v63 = vpop.xlane.xlu1 %1191 }
 0x442   :  { %v1236_v40 = vsub.f32 %v2387_v11, %v1192_v63  ;;  %1863 = vpow2.f32 %v1275_v57 }
 0x443   :  { %v2494_v1 = vpop.eup %1853  ;;  %v1285_v5 = vmul.f32 1.442695, %v1235_v61  ;;  %1335 = vadd.xlane.f32.xlu1 %v2491_v4 }
 0x444   :  { %v1287_v52 = vmul.f32 1.442695, %v1236_v40  ;;  %1329 = vadd.xlane.f32.xlu0 %v2494_v1  ;;  %v1186_v3 = vpop.xlane.xlu0 %1185  ;;  %v2499_v8 = vpop.eup %1855 }
 0x445   :  { %1865 = vpow2.f32 %v1285_v5  ;;  %v1233_v6 = vsub.f32 %v2392_v13, %v1186_v3  ;;  %v1188_v44 = vpop.xlane.xlu1 %1187 }
 0x446   :  { %v1234_v9 = vsub.f32 %v2395_v14, %v1188_v44  ;;  %1867 = vpow2.f32 %v1287_v52 }
 0x447   :  { %v2502_v45 = vpop.eup %1857  ;;  %v1281_v11 = vmul.f32 1.442695, %v1233_v6  ;;  %1331 = vadd.xlane.f32.xlu1 %v2499_v8 }
 0x448   :  { %v1283_v12 = vmul.f32 1.442695, %v1234_v9  ;;  %1341 = vadd.xlane.f32.xlu0 %v2502_v45  ;;  %v1198_v47 = vpop.xlane.xlu0 %1197  ;;  %v2507_v13 = vpop.eup %1859 }
 0x449   :  { %1869 = vpow2.f32 %v1281_v11  ;;  %v1239_v15 = vsub.f32 %v2399_v16, %v1198_v47  ;;  %v1200_v50 = vpop.xlane.xlu1 %1199 }
 0x44a   :  { %v1240_v18 = vsub.f32 %v2403_v19, %v1200_v50  ;;  %1871 = vpow2.f32 %v1283_v12 }
 0x44b   :  { %v2510_v0 = vpop.eup %1861  ;;  %v1293_v14 = vmul.f32 1.442695, %v1239_v15  ;;  %1343 = vadd.xlane.f32.xlu1 %v2507_v13 }
 0x44c   :  { %v1295_v23 = vmul.f32 1.442695, %v1240_v18  ;;  %1337 = vadd.xlane.f32.xlu0 %v2510_v0  ;;  %v1194_v53 = vpop.xlane.xlu0 %1193  ;;  %v2515_v16 = vpop.eup %1863 }
 0x44d   :  { %1873 = vpow2.f32 %v1293_v14  ;;  %v1237_v25 = vsub.f32 %v2408_v21, %v1194_v53  ;;  %v1196_v26 = vpop.xlane.xlu1 %1195 }
 0x44e   :  { %v1238_v28 = vsub.f32 %v2411_v22, %v1196_v26  ;;  %1875 = vpow2.f32 %v1295_v23 }
 0x44f   :  { %v2518_v55 = vpop.eup %1865  ;;  %v1289_v19 = vmul.f32 1.442695, %v1237_v25  ;;  %1339 = vadd.xlane.f32.xlu1 %v2515_v16 }
 0x450   :  { %v1291_v34 = vmul.f32 1.442695, %v1238_v28  ;;  %1349 = vadd.xlane.f32.xlu0 %v2518_v55  ;;  %v1206_v58 = vpop.xlane.xlu0 %1205  ;;  %v2523_v21 = vpop.eup %1867 }
 0x451   :  { %1877 = vpow2.f32 %v1289_v19  ;;  %v1243_v35 = vsub.f32 %v2415_v24, %v1206_v58  ;;  %v1208_v41 = vpop.xlane.xlu1 %1207 }
 0x452   :  { %v1244_v42 = vsub.f32 %v2419_v27, %v1208_v41  ;;  %1879 = vpow2.f32 %v1291_v34 }
 0x453   :  { %v2526_v43 = vpop.eup %1869  ;;  %v1301_v22 = vmul.f32 1.442695, %v1243_v35  ;;  %1351 = vadd.xlane.f32.xlu1 %v2523_v21 }
 0x454   :  { %v1303_v60 = vmul.f32 1.442695, %v1244_v42  ;;  %1345 = vadd.xlane.f32.xlu0 %v2526_v43  ;;  %v1202_v48 = vpop.xlane.xlu0 %1201  ;;  %v2531_v24 = vpop.eup %1871 }
 0x455   :  { %1881 = vpow2.f32 %v1301_v22  ;;  %v1241_v49 = vsub.f32 %v2424_v29, %v1202_v48  ;;  %v1204_v51 = vpop.xlane.xlu1 %1203 }
 0x456   :  { %v1242_v54 = vsub.f32 %v2427_v30, %v1204_v51  ;;  %1883 = vpow2.f32 %v1303_v60 }
 0x457   :  { %v2534_v56 = vpop.eup %1873  ;;  %v1297_v27 = vmul.f32 1.442695, %v1241_v49  ;;  %1347 = vadd.xlane.f32.xlu1 %v2531_v24 }
 0x458   :  { %v1299_v2 = vmul.f32 1.442695, %v1242_v54  ;;  %1357 = vadd.xlane.f32.xlu0 %v2534_v56  ;;  %v1210_v57 = vpop.xlane.xlu0 %1209  ;;  %v2539_v61 = vpop.eup %1875 }
 0x459   :  { %1885 = vpow2.f32 %v1297_v27  ;;  %v1245_v7 = vsub.f32 %v2432_v33, %v1210_v57 }
 0x45a   :  { %v1212_v29 = vpop.xlane.xlu1 %1211  ;;  %1887 = vpow2.f32 %v1299_v2 }
 0x45b   :  { %v2541_v63 = vpop.eup %1877  ;;  %v1305_v40 = vmul.f32 1.442695, %v1245_v7  ;;  %v1246_v30 = vsub.f32 %v2435_v36, %v1212_v29  ;;  %1359 = vadd.xlane.f32.xlu1 %v2539_v61 }
 0x45c   :  { %1353 = vadd.xlane.f32.xlu0 %v2541_v63  ;;  %v1214_v5 = vpop.xlane.xlu0 %1213  ;;  %v2547_v6 = vpop.eup %1879 }
 0x45d   :  { %1889 = vpow2.f32 %v1305_v40  ;;  %v1307_v52 = vmul.f32 1.442695, %v1246_v30  ;;  %v1247_v3 = vsub.f32 %v2439_v37, %v1214_v5 }
 0x45e   :  { %v1216_v33 = vpop.xlane.xlu1 %1215 }
 0x45f   :  { %v2549_v44 = vpop.eup %1881  ;;  %1891 = vpow2.f32 %v1307_v52  ;;  %v1309_v9 = vmul.f32 1.442695, %v1247_v3  ;;  %v1248_v11 = vsub.f32 %v2443_v39, %v1216_v33  ;;  %1355 = vadd.xlane.f32.xlu1 %v2547_v6 }
 0x460   :  { %1365 = vadd.xlane.f32.xlu0 %v2549_v44  ;;  %v2554_v12 = vpop.eup %1883 }
 0x461   :  { %1893 = vpow2.f32 %v1309_v9  ;;  %v1311_v36 = vmul.f32 1.442695, %v1248_v11 }
 0x463   :  { %v2556_v47 = vpop.eup %1885  ;;  %1895 = vpow2.f32 %v1311_v36  ;;  %1367 = vadd.xlane.f32.xlu1 %v2554_v12 }
 0x464   :  { %1361 = vadd.xlane.f32.xlu0 %v2556_v47  ;;  %v2560_v37 = vpop.eup %1887 }
 0x467   :  { %v2562_v15 = vpop.eup %1889  ;;  %1363 = vadd.xlane.f32.xlu1 %v2560_v37 }
 0x468   :  { %1369 = vadd.xlane.f32.xlu0 %v2562_v15 }
 0x469   :  { %v2566_v39 = vpop.eup %1891 }
 0x46b   :  { %v2568_v50 = vpop.eup %1893  ;;  %1371 = vadd.xlane.f32.xlu1 %v2566_v39 }
 0x46c   :  { %1373 = vadd.xlane.f32.xlu0 %v2568_v50 }
 0x46d   :  { %v2572_v18 = vpop.eup %1895 }
 0x46f   :  { %1375 = vadd.xlane.f32.xlu1 %v2572_v18 }
 0x4bc   :  { %v1318_v14 = vpop.xlane.xlu0 %1317 }
 0x4bd   :  { %1897 = vrcp.f32 %v1318_v14 }
 0x4c0   :  { %v1320_v23 = vpop.xlane.xlu1 %1319  ;;  %v1314_v53 = vpop.xlane.xlu0 %1313 }
 0x4c1   :  { %1899 = vrcp.f32 %v1320_v23 }
 0x4c2   :  { %1901 = vrcp.f32 %v1314_v53 }
 0x4c4   :  { %v1316_v25 = vpop.xlane.xlu1 %1315 }
 0x4c5   :  { %1903 = vrcp.f32 %v1316_v25  ;;  %v1326_v26 = vpop.xlane.xlu0 %1325 }
 0x4c6   :  { %1905 = vrcp.f32 %v1326_v26 }
 0x4c7   :  { %v1898_v28 = vpop.eup %1897 }
 0x4c8   :  { %v1411_v19 = vmul.f32 %v1898_v28, %v2454_v10  ;;  %v1328_v34 = vpop.xlane.xlu1 %1327 }
 0x4c9   :  { %1907 = vrcp.f32 %v1328_v34  ;;  %v1322_v58 = vpop.xlane.xlu0 %1321 }
 0x4ca   :  { %1443 = vst [vmem:[%s2712_s9 + $0x10] sm:$0xff] %v1411_v19  ;;  %1909 = vrcp.f32 %v1322_v58 }
 0x4cb   :  { %v1900_v35 = vpop.eup %1899 }
 0x4cc   :  { %v1902_v41 = vpop.eup %1901  ;;  %v1412_v42 = vmul.f32 %v1900_v35, %v2461_v20  ;;  %v1324_v22 = vpop.xlane.xlu1 %1323 }
 0x4cd   :  { %v1409_v60 = vmul.f32 %v1902_v41, %v2458_v17  ;;  %1911 = vrcp.f32 %v1324_v22  ;;  %v1334_v48 = vpop.xlane.xlu0 %1333 }
 0x4ce   :  { %1444 = vst [vmem:[%s2712_s9 + $0x18] sm:$0xff] %v1412_v42  ;;  %1913 = vrcp.f32 %v1334_v48 }
 0x4cf   :  { %v1904_v10 = vpop.eup %1903  ;;  %1441 = vst [vmem:[%s2712_s9] sm:$0xff] %v1409_v60 }
 0x4d0   :  { %v1906_v49 = vpop.eup %1905  ;;  %v1410_v51 = vmul.f32 %v1904_v10, %v2467_v31  ;;  %v1336_v54 = vpop.xlane.xlu1 %1335 }
 0x4d1   :  { %v1415_v20 = vmul.f32 %v1906_v49, %v2470_v32  ;;  %1915 = vrcp.f32 %v1336_v54  ;;  %v1330_v17 = vpop.xlane.xlu0 %1329 }
 0x4d2   :  { %1442 = vst [vmem:[%s2712_s9 + $0x8] sm:$0xff] %v1410_v51  ;;  %1917 = vrcp.f32 %v1330_v17 }
 0x4d3   :  { %v1908_v27 = vpop.eup %1907  ;;  %1447 = vst [vmem:[%s2712_s9 + $0x30] sm:$0xff] %v1415_v20 }
 0x4d4   :  { %v1910_v2 = vpop.eup %1909  ;;  %v1416_v57 = vmul.f32 %v1908_v27, %v2475_v59  ;;  %v1332_v7 = vpop.xlane.xlu1 %1331 }
 0x4d5   :  { %v1413_v31 = vmul.f32 %v1910_v2, %v2478_v46  ;;  %1919 = vrcp.f32 %v1332_v7  ;;  %v1342_v32 = vpop.xlane.xlu0 %1341 }
 0x4d6   :  { %1448 = vst [vmem:[%s2712_s9 + $0x38] sm:$0xff] %v1416_v57  ;;  %1921 = vrcp.f32 %v1342_v32 }
 0x4d7   :  { %v1912_v29 = vpop.eup %1911  ;;  %1445 = vst [vmem:[%s2712_s9 + $0x20] sm:$0xff] %v1413_v31 }
 0x4d8   :  { %v1914_v40 = vpop.eup %1913  ;;  %v1414_v30 = vmul.f32 %v1912_v29, %v2483_v62  ;;  %v1344_v5 = vpop.xlane.xlu1 %1343 }
 0x4d9   :  { %v1419_v59 = vmul.f32 %v1914_v40, %v2486_v38  ;;  %1923 = vrcp.f32 %v1344_v5  ;;  %v1338_v46 = vpop.xlane.xlu0 %1337 }
 0x4da   :  { %1446 = vst [vmem:[%s2712_s9 + $0x28] sm:$0xff] %v1414_v30  ;;  %1925 = vrcp.f32 %v1338_v46 }
 0x4db   :  { %v1916_v52 = vpop.eup %1915  ;;  %1451 = vst [vmem:[%s2712_s9 + $0x50] sm:$0xff] %v1419_v59 }
 0x4dc   :  { %v1918_v3 = vpop.eup %1917  ;;  %v1420_v33 = vmul.f32 %v1916_v52, %v2491_v4  ;;  %v1340_v9 = vpop.xlane.xlu1 %1339 }
 0x4dd   :  { %v1417_v62 = vmul.f32 %v1918_v3, %v2494_v1  ;;  %1927 = vrcp.f32 %v1340_v9  ;;  %v1350_v38 = vpop.xlane.xlu0 %1349 }
 0x4de   :  { %1452 = vst [vmem:[%s2712_s9 + $0x58] sm:$0xff] %v1420_v33  ;;  %1929 = vrcp.f32 %v1350_v38 }
 0x4df   :  { %v1920_v11 = vpop.eup %1919  ;;  %1449 = vst [vmem:[%s2712_s9 + $0x40] sm:$0xff] %v1417_v62 }
 0x4e0   :  { %v1922_v36 = vpop.eup %1921  ;;  %v1418_v14 = vmul.f32 %v1920_v11, %v2499_v8  ;;  %v1352_v23 = vpop.xlane.xlu1 %1351 }
 0x4e1   :  { %v1423_v4 = vmul.f32 %v1922_v36, %v2502_v45  ;;  %1931 = vrcp.f32 %v1352_v23  ;;  %v1346_v1 = vpop.xlane.xlu0 %1345 }
 0x4e2   :  { %1450 = vst [vmem:[%s2712_s9 + $0x48] sm:$0xff] %v1418_v14  ;;  %1933 = vrcp.f32 %v1346_v1 }
 0x4e3   :  { %v1924_v53 = vpop.eup %1923  ;;  %1455 = vst [vmem:[%s2712_s9 + $0x70] sm:$0xff] %v1423_v4 }
 0x4e4   :  { %v1926_v25 = vpop.eup %1925  ;;  %v1424_v26 = vmul.f32 %v1924_v53, %v2507_v13  ;;  %v1348_v28 = vpop.xlane.xlu1 %1347 }
 0x4e5   :  { %v1421_v8 = vmul.f32 %v1926_v25, %v2510_v0  ;;  %1935 = vrcp.f32 %v1348_v28  ;;  %v1358_v45 = vpop.xlane.xlu0 %1357 }
 0x4e6   :  { %1456 = vst [vmem:[%s2712_s9 + $0x78] sm:$0xff] %v1424_v26  ;;  %1937 = vrcp.f32 %v1358_v45 }
 0x4e7   :  { %v1928_v19 = vpop.eup %1927  ;;  %1453 = vst [vmem:[%s2712_s9 + $0x60] sm:$0xff] %v1421_v8 }
 0x4e8   :  { %v1930_v34 = vpop.eup %1929  ;;  %v1422_v58 = vmul.f32 %v1928_v19, %v2515_v16  ;;  %v1360_v35 = vpop.xlane.xlu1 %1359 }
 0x4e9   :  { %v1427_v13 = vmul.f32 %v1930_v34, %v2518_v55  ;;  %1939 = vrcp.f32 %v1360_v35  ;;  %v1354_v0 = vpop.xlane.xlu0 %1353 }
 0x4ea   :  { %1454 = vst [vmem:[%s2712_s9 + $0x68] sm:$0xff] %v1422_v58  ;;  %1941 = vrcp.f32 %v1354_v0 }
 0x4eb   :  { %v1932_v41 = vpop.eup %1931  ;;  %1459 = vst [vmem:[%s2712_s9 + $0x90] sm:$0xff] %v1427_v13 }
 0x4ec   :  { %v1934_v42 = vpop.eup %1933  ;;  %v1428_v22 = vmul.f32 %v1932_v41, %v2523_v21  ;;  %v1356_v60 = vpop.xlane.xlu1 %1355 }
 0x4ed   :  { %v1425_v16 = vmul.f32 %v1934_v42, %v2526_v43  ;;  %1943 = vrcp.f32 %v1356_v60  ;;  %v1366_v55 = vpop.xlane.xlu0 %1365 }
 0x4ee   :  { %1460 = vst [vmem:[%s2712_s9 + $0x98] sm:$0xff] %v1428_v22  ;;  %1945 = vrcp.f32 %v1366_v55 }
 0x4ef   :  { %v1936_v48 = vpop.eup %1935  ;;  %1457 = vst [vmem:[%s2712_s9 + $0x80] sm:$0xff] %v1425_v16 }
 0x4f0   :  { %v1938_v10 = vpop.eup %1937  ;;  %v1426_v49 = vmul.f32 %v1936_v48, %v2531_v24  ;;  %v1368_v51 = vpop.xlane.xlu1 %1367 }
 0x4f1   :  { %v1431_v21 = vmul.f32 %v1938_v10, %v2534_v56  ;;  %1947 = vrcp.f32 %v1368_v51  ;;  %v1362_v43 = vpop.xlane.xlu0 %1361 }
 0x4f2   :  { %1458 = vst [vmem:[%s2712_s9 + $0x88] sm:$0xff] %v1426_v49  ;;  %1949 = vrcp.f32 %v1362_v43 }
 0x4f3   :  { %v1940_v54 = vpop.eup %1939  ;;  %1463 = vst [vmem:[%s2712_s9 + $0xb0] sm:$0xff] %v1431_v21 }
 0x4f4   :  { %v1942_v20 = vpop.eup %1941  ;;  %v1432_v17 = vmul.f32 %v1940_v54, %v2539_v61  ;;  %v1364_v27 = vpop.xlane.xlu1 %1363 }
 0x4f5   :  { %v1429_v24 = vmul.f32 %v1942_v20, %v2541_v63  ;;  %1951 = vrcp.f32 %v1364_v27  ;;  %v1370_v56 = vpop.xlane.xlu0 %1369 }
 0x4f6   :  { %1464 = vst [vmem:[%s2712_s9 + $0xb8] sm:$0xff] %v1432_v17  ;;  %1953 = vrcp.f32 %v1370_v56 }
 0x4f7   :  { %v1944_v2 = vpop.eup %1943  ;;  %1461 = vst [vmem:[%s2712_s9 + $0xa0] sm:$0xff] %v1429_v24 }
 0x4f8   :  { %v1946_v57 = vpop.eup %1945  ;;  %v1430_v7 = vmul.f32 %v1944_v2, %v2547_v6  ;;  %v1372_v31 = vpop.xlane.xlu1 %1371 }
 0x4f9   :  { %v1435_v61 = vmul.f32 %v1946_v57, %v2549_v44  ;;  %1955 = vrcp.f32 %v1372_v31  ;;  %v1374_v63 = vpop.xlane.xlu0 %1373 }
 0x4fa   :  { %1462 = vst [vmem:[%s2712_s9 + $0xa8] sm:$0xff] %v1430_v7  ;;  %1957 = vrcp.f32 %v1374_v63 }
 0x4fb   :  { %v1948_v32 = vpop.eup %1947  ;;  %1467 = vst [vmem:[%s2712_s9 + $0xd0] sm:$0xff] %v1435_v61 }
 0x4fc   :  { %v1950_v29 = vpop.eup %1949  ;;  %v1436_v40 = vmul.f32 %v1948_v32, %v2554_v12  ;;  %v1376_v30 = vpop.xlane.xlu1 %1375 }
 0x4fd   :  { %v1433_v6 = vmul.f32 %v1950_v29, %v2556_v47  ;;  %1959 = vrcp.f32 %v1376_v30 }
 0x4fe   :  { %1468 = vst [vmem:[%s2712_s9 + $0xd8] sm:$0xff] %v1436_v40 }
 0x4ff   :  { %v1952_v44 = vpop.eup %1951  ;;  %1465 = vst [vmem:[%s2712_s9 + $0xc0] sm:$0xff] %v1433_v6 }
 0x500   :  { %v1954_v5 = vpop.eup %1953  ;;  %v1434_v59 = vmul.f32 %v1952_v44, %v2560_v37 }
 0x501   :  { %v1437_v46 = vmul.f32 %v1954_v5, %v2562_v15 }
 0x502   :  { %1466 = vst [vmem:[%s2712_s9 + $0xc8] sm:$0xff] %v1434_v59 }
 0x503   :  { %v1956_v12 = vpop.eup %1955  ;;  %1469 = vst [vmem:[%s2712_s9 + $0xe0] sm:$0xff] %v1437_v46 }
 0x504   :  { %v1958_v47 = vpop.eup %1957  ;;  %v1438_v52 = vmul.f32 %v1956_v12, %v2566_v39 }
 0x505   :  { %v1439_v3 = vmul.f32 %v1958_v47, %v2568_v50 }
 0x506   :  { %1470 = vst [vmem:[%s2712_s9 + $0xe8] sm:$0xff] %v1438_v52 }
 0x507   :  { %v1960_v37 = vpop.eup %1959  ;;  %1471 = vst [vmem:[%s2712_s9 + $0xf0] sm:$0xff] %v1439_v3 }
 0x508   :  { %v1440_v15 = vmul.f32 %v1960_v37, %v2572_v18 }
 0x50a   :  { %1472 = vst [vmem:[%s2712_s9 + $0xf8] sm:$0xff] %v1440_v15 }

</bundles_post_ra>
